<compile_context>
chip_gen: v7x
topology: tpu7x:2x2x1
jax: 0.10.0
libtpu: 0.0.40
codegen_flags: <defaults>
</compile_context>

<pallas_src>
import functools
from typing import NamedTuple

import jax
import jax.numpy as jnp
from jax.experimental import pallas as pl
from jax.experimental.pallas import tpu as pltpu

LN_EPS = 1e-5  # PyTorch nn.LayerNorm default


def _round_up(n: int, m: int) -> int:
    return (n + m - 1) // m * m


def _tensorcores_per_chip() -> int:
    """2 tiles for multi-TensorCore chips (v7x, megacore v4/v5p), else 1."""
    try:
        kind = jax.devices()[0].device_kind.lower()
    except Exception:
        return 1
    return 2 if any(tag in kind for tag in ("7", "v4", "v5p")) else 1


class DQNMeta(NamedTuple):
    d_in: int
    h1: int
    h2: int
    out_dim: int
    H: int        # lane-dense padded feature width (multiple of 128)
    off_w1: int
    off_w2: int
    off_w3: int


def _layer_norm(h, gamma, beta, n):
    # One-pass LN in f32: sum(h) and sum(h*h) are independent cross-lane
    # reductions.  Padded columns of h are exactly zero, so dividing by the
    # true feature count `n` (not H) reproduces the unpadded statistics.
    inv_n = 1.0 / float(n)
    s1 = jnp.sum(h, axis=-1, keepdims=True)
    s2 = jnp.sum(h * h, axis=-1, keepdims=True)
    mu = s1 * inv_n
    var = jnp.maximum(s2 * inv_n - mu * mu, 0.0)
    return (h - mu) * jax.lax.rsqrt(var + LN_EPS) * gamma + beta


def dqn_kernel(x_ref, wb_ref, o_ref, *, meta: DQNMeta):
    f32 = jnp.float32
    cdt = wb_ref.dtype                 # MXU input dtype (bf16 slab by default)
    d_in, h1, h2, H = meta.d_in, meta.h1, meta.h2, meta.H
    o1, o2, o3 = meta.off_w1, meta.off_w2, meta.off_w3

    x = x_ref[...].astype(cdt)                               # [TB, d_in]

    # ---- hidden layer 1: Linear -> LayerNorm -> ReLU --------------------
    w1 = wb_ref[o1:o1 + d_in, :]                             # [d_in, H]
    b1 = wb_ref[o1 + d_in:o1 + d_in + 1, :].astype(f32)
    g1 = wb_ref[o1 + d_in + 1:o1 + d_in + 2, :].astype(f32)
    be1 = wb_ref[o1 + d_in + 2:o1 + d_in + 3, :].astype(f32)
    h = jnp.dot(x, w1, preferred_element_type=f32) + b1
    h = _layer_norm(h, g1, be1, h1)
    h = jnp.maximum(h, 0.0)

    # ---- hidden layer 2: Linear -> LayerNorm -> ReLU --------------------
    w2 = wb_ref[o2:o2 + H, :]                                # [H, H]
    b2 = wb_ref[o2 + H:o2 + H + 1, :].astype(f32)
    g2 = wb_ref[o2 + H + 1:o2 + H + 2, :].astype(f32)
    be2 = wb_ref[o2 + H + 2:o2 + H + 3, :].astype(f32)
    h = jnp.dot(h.astype(cdt), w2, preferred_element_type=f32) + b2
    h = _layer_norm(h, g2, be2, h2)
    h = jnp.maximum(h, 0.0)

    # ---- output layer: Linear (lane-dense padded columns) ---------------
    w3 = wb_ref[o3:o3 + H, :]                                # [H, H]
    b3 = wb_ref[o3 + H:o3 + H + 1, :].astype(f32)
    q = jnp.dot(h.astype(cdt), w3, preferred_element_type=f32) + b3
    o_ref[...] = q.astype(o_ref.dtype)


def pack_params(params, *, dtype=jnp.bfloat16):
    """Build the single lane-dense weight slab ONCE (at init / after each
    param update), NOT in the per-forward path.

    Row layout (all sections 16-row aligned so weight ref-slices are
    sublane-tile aligned for both f32 and bf16):
        [w1 (d_in rows) | b1 | g1 | be1 | pad]   -> off_w1 = 0
        [w2 (H rows)    | b2 | g2 | be2 | pad]   -> off_w2
        [w3 (H rows)    | b3              | pad] -> off_w3
    """
    d_in, h1 = params["w1"].shape
    h2 = params["w2"].shape[1]
    out_dim = params["w3"].shape[1]
    H = _round_up(max(h1, h2, out_dim, 128), 128)
    assert h1 <= H and h2 <= H and out_dim <= H

    ALIGN = 16
    rows1 = _round_up(d_in + 3, ALIGN)
    rows2 = _round_up(H + 3, ALIGN)
    rows3 = _round_up(H + 1, ALIGN)
    off_w1, off_w2, off_w3 = 0, rows1, rows1 + rows2
    total = rows1 + rows2 + rows3

    wb = jnp.zeros((total, H), jnp.float32)
    wb = wb.at[off_w1:off_w1 + d_in, :h1].set(params["w1"])
    wb = wb.at[off_w1 + d_in:off_w1 + d_in + 1, :h1].set(params["b1"])
    wb = wb.at[off_w1 + d_in + 1:off_w1 + d_in + 2, :h1].set(params["g1"])
    wb = wb.at[off_w1 + d_in + 2:off_w1 + d_in + 3, :h1].set(params["be1"])
    wb = wb.at[off_w2:off_w2 + h1, :h2].set(params["w2"])
    wb = wb.at[off_w2 + H:off_w2 + H + 1, :h2].set(params["b2"])
    wb = wb.at[off_w2 + H + 1:off_w2 + H + 2, :h2].set(params["g2"])
    wb = wb.at[off_w2 + H + 2:off_w2 + H + 3, :h2].set(params["be2"])
    wb = wb.at[off_w3:off_w3 + h2, :out_dim].set(params["w3"])
    wb = wb.at[off_w3 + H:off_w3 + H + 1, :out_dim].set(params["b3"])
    wb = wb.astype(dtype)

    meta = DQNMeta(d_in=d_in, h1=h1, h2=h2, out_dim=out_dim, H=H,
                   off_w1=off_w1, off_w2=off_w2, off_w3=off_w3)
    return wb, meta


def dqn_forward(x, wb, meta: DQNMeta, *, num_splits=None, max_tile_b=1024):
    """x: [B, d_in] f32; wb/meta from pack_params.

    Returns the lane-dense padded Q buffer [B_pad, H] f32.  Slice
    [:B, :meta.out_dim] only where the narrow view is actually consumed
    (e.g. the final argmax) to avoid an extra HBM pass in the wrapper.
    """
    B, d_in = x.shape
    assert d_in == meta.d_in

    if num_splits is None:
        num_splits = _tensorcores_per_chip()
    # Whole padded batch in one grid step on single-TC parts; `num_splits`
    # even, sublane-aligned tiles on multi-TC parts so every core gets work.
    tile_b = _round_up(pl.cdiv(B, num_splits), 8)
    tile_b = max(8, min(tile_b, max_tile_b))
    num_tiles = pl.cdiv(B, tile_b)
    b_pad = num_tiles * tile_b
    if b_pad != B:
        x = jnp.pad(x, ((0, b_pad - B), (0, 0)))

    kernel = functools.partial(dqn_kernel, meta=meta)

    # TODO(synk): if the training loop calls this per tiny batch, batch the
    # online + target nets (or multiple micro-batches) into one pallas_call.
    return pl.pallas_call(
        kernel,
        out_shape=jax.ShapeDtypeStruct((b_pad, meta.H), jnp.float32),
        grid_spec=pl.GridSpec(
            grid=(num_tiles,),
            in_specs=[
                pl.BlockSpec((tile_b, d_in), lambda i: (i, 0)),   # per-tile x
                pl.BlockSpec(wb.shape, lambda i: (0, 0)),         # resident slab
            ],
            out_specs=pl.BlockSpec((tile_b, meta.H), lambda i: (i, 0)),
        ),
        compiler_params=pltpu.CompilerParams(
            dimension_semantics=("parallel",)),   # both TCs on v7x
    )(x, wb)


def init_params(key, input_dim, output_dim, hidden_dims):
    """Deterministic init mimicking nn.Linear default (uniform +/- 1/sqrt(fan_in))
    and nn.LayerNorm default (gamma=1, beta=0)."""
    dims = [input_dim] + list(hidden_dims) + [output_dim]
    keys = jax.random.split(key, 2 * (len(dims) - 1))
    params = {}
    for i, name in enumerate(["1", "2", "3"]):
        fan_in, fan_out = dims[i], dims[i + 1]
        bound = 1.0 / jnp.sqrt(fan_in)
        params[f"w{name}"] = jax.random.uniform(
            keys[2 * i], (fan_in, fan_out), minval=-bound, maxval=bound,
            dtype=jnp.float32)
        params[f"b{name}"] = jax.random.uniform(
            keys[2 * i + 1], (1, fan_out), minval=-bound, maxval=bound,
            dtype=jnp.float32)
    params["g1"] = jnp.ones((1, hidden_dims[0]), jnp.float32)
    params["be1"] = jnp.zeros((1, hidden_dims[0]), jnp.float32)
    params["g2"] = jnp.ones((1, hidden_dims[1]), jnp.float32)
    params["be2"] = jnp.zeros((1, hidden_dims[1]), jnp.float32)
    return params


def dqn_reference(x, p):
    """Pure-JAX f32 reference (two-pass LayerNorm, matches PyTorch semantics)."""
    def ln(h, g, b):
        mu = jnp.mean(h, -1, keepdims=True)
        var = jnp.mean((h - mu) ** 2, -1, keepdims=True)
        return (h - mu) / jnp.sqrt(var + LN_EPS) * g + b
    h = jnp.maximum(ln(x @ p["w1"] + p["b1"], p["g1"], p["be1"]), 0.0)
    h = jnp.maximum(ln(h @ p["w2"] + p["b2"], p["g2"], p["be2"]), 0.0)
    return h @ p["w3"] + p["b3"]


if __name__ == "__main__":
    input_dim = 32
    output_dim = 4
    hidden_dims = [128, 64]
    batch = 256   # realistic DQN batch: 1 tile on v5e/v6e, 2 even tiles on v7x

    key = jax.random.PRNGKey(0)
    k_x, k_p = jax.random.split(key)
    x = jax.random.normal(k_x, (batch, input_dim), dtype=jnp.float32)
    params = init_params(k_p, input_dim, output_dim, hidden_dims)

    # Pack the weight slab ONCE (per param update), outside the forward path.
    wb, meta = pack_params(params, dtype=jnp.bfloat16)

    fwd = jax.jit(functools.partial(dqn_forward, meta=meta))
    q_pad = jax.block_until_ready(fwd(x, wb))          # [batch, 128] padded

    # Narrow view only where actually needed (here: the correctness check).
    q = q_pad[:batch, :meta.out_dim]
    q_ref = dqn_reference(x, params)
    assert q.shape == (batch, output_dim)
    # bf16 MXU inputs vs. f32 reference -> slightly loosened tolerance.
    assert jnp.allclose(q, q_ref, atol=5e-2, rtol=5e-2), "mismatch vs reference"

    print("KERNEL_OK")
</pallas_src>

<mosaic_0001>
module attributes {stable_mosaic.version = 11 : i64} {
  func.func @dqn_kernel(%arg0: i32, %arg1: memref<256x32xf32, #tpu.memory_space<vmem>>, %arg2: memref<336x128xbf16, #tpu.memory_space<vmem>>, %arg3: memref<256x128xf32, #tpu.memory_space<vmem>>) attributes {dimension_semantics = [#tpu.dimension_semantics<parallel>], iteration_bounds = array<i64: 1>, scalar_prefetch = 0 : i64, scratch_operands = 0 : i64, tpu.core_type = #tpu.core_type<tc>, window_params = [{transform_indices = @transform_0, window_bounds = array<i64: 256, 32>}, {pipeline_mode = #tpu.pipeline_mode<synchronous>, transform_indices = @transform_1, window_bounds = array<i64: 336, 128>}, {transform_indices = @transform_2, window_bounds = array<i64: 256, 128>}]} {
    %c0 = arith.constant 0 : index
    %c0_0 = arith.constant 0 : index
    %0 = vector.load %arg1[%c0, %c0_0] : memref<256x32xf32, #tpu.memory_space<vmem>>, vector<256x32xf32>
    %1 = arith.truncf %0 : vector<256x32xf32> to vector<256x32xbf16>
    %c0_1 = arith.constant 0 : index
    %c0_2 = arith.constant 0 : index
    %2 = vector.load %arg2[%c0_1, %c0_2] : memref<336x128xbf16, #tpu.memory_space<vmem>>, vector<32x128xbf16>
    %c32 = arith.constant 32 : index
    %c0_3 = arith.constant 0 : index
    %3 = vector.load %arg2[%c32, %c0_3] : memref<336x128xbf16, #tpu.memory_space<vmem>>, vector<1x128xbf16>
    %4 = arith.extf %3 : vector<1x128xbf16> to vector<1x128xf32>
    %c33 = arith.constant 33 : index
    %c0_4 = arith.constant 0 : index
    %5 = vector.load %arg2[%c33, %c0_4] : memref<336x128xbf16, #tpu.memory_space<vmem>>, vector<1x128xbf16>
    %6 = arith.extf %5 : vector<1x128xbf16> to vector<1x128xf32>
    %c34 = arith.constant 34 : index
    %c0_5 = arith.constant 0 : index
    %7 = vector.load %arg2[%c34, %c0_5] : memref<336x128xbf16, #tpu.memory_space<vmem>>, vector<1x128xbf16>
    %8 = arith.extf %7 : vector<1x128xbf16> to vector<1x128xf32>
    %cst = arith.constant dense<0.000000e+00> : vector<256x128xf32>
    %9 = tpu.matmul %1, %2, %cst {dimension_numbers = #tpu.dot_dimension_numbers<[1], [0], [0], [1], [0, 0, 1, 1], [], []>} : vector<256x32xbf16>, vector<32x128xbf16>, vector<256x128xf32> -> vector<256x128xf32>
    %10 = vector.broadcast %4 : vector<1x128xf32> to vector<256x128xf32>
    %11 = arith.addf %9, %10 : vector<256x128xf32>
    %cst_6 = arith.constant dense<0.000000e+00> : vector<256xf32>
    %12 = vector.multi_reduction <add>, %11, %cst_6 [1] : vector<256x128xf32> to vector<256xf32>
    %13 = vector.shape_cast %12 : vector<256xf32> to vector<256x1xf32>
    %14 = arith.mulf %11, %11 : vector<256x128xf32>
    %cst_7 = arith.constant dense<0.000000e+00> : vector<256xf32>
    %15 = vector.multi_reduction <add>, %14, %cst_7 [1] : vector<256x128xf32> to vector<256xf32>
    %16 = vector.shape_cast %15 : vector<256xf32> to vector<256x1xf32>
    %cst_8 = arith.constant 7.812500e-03 : f32
    %17 = vector.broadcast %cst_8 : f32 to vector<256x1xf32>
    %18 = arith.mulf %13, %17 : vector<256x1xf32>
    %cst_9 = arith.constant 7.812500e-03 : f32
    %19 = vector.broadcast %cst_9 : f32 to vector<256x1xf32>
    %20 = arith.mulf %16, %19 : vector<256x1xf32>
    %21 = arith.mulf %18, %18 : vector<256x1xf32>
    %22 = arith.subf %20, %21 : vector<256x1xf32>
    %cst_10 = arith.constant 0.000000e+00 : f32
    %23 = vector.broadcast %cst_10 : f32 to vector<256x1xf32>
    %24 = arith.maximumf %22, %23 : vector<256x1xf32>
    %25 = vector.broadcast %18 : vector<256x1xf32> to vector<256x128xf32>
    %26 = arith.subf %11, %25 : vector<256x128xf32>
    %cst_11 = arith.constant 9.99999974E-6 : f32
    %27 = vector.broadcast %cst_11 : f32 to vector<256x1xf32>
    %28 = arith.addf %24, %27 : vector<256x1xf32>
    %29 = math.rsqrt %28 : vector<256x1xf32>
    %30 = vector.broadcast %29 : vector<256x1xf32> to vector<256x128xf32>
    %31 = arith.mulf %26, %30 : vector<256x128xf32>
    %32 = vector.broadcast %6 : vector<1x128xf32> to vector<256x128xf32>
    %33 = arith.mulf %31, %32 : vector<256x128xf32>
    %34 = vector.broadcast %8 : vector<1x128xf32> to vector<256x128xf32>
    %35 = arith.addf %33, %34 : vector<256x128xf32>
    %cst_12 = arith.constant 0.000000e+00 : f32
    %36 = vector.broadcast %cst_12 : f32 to vector<256x128xf32>
    %37 = arith.maximumf %35, %36 : vector<256x128xf32>
    %c48 = arith.constant 48 : index
    %c0_13 = arith.constant 0 : index
    %38 = vector.load %arg2[%c48, %c0_13] : memref<336x128xbf16, #tpu.memory_space<vmem>>, vector<128x128xbf16>
    %c176 = arith.constant 176 : index
    %c0_14 = arith.constant 0 : index
    %39 = vector.load %arg2[%c176, %c0_14] : memref<336x128xbf16, #tpu.memory_space<vmem>>, vector<1x128xbf16>
    %40 = arith.extf %39 : vector<1x128xbf16> to vector<1x128xf32>
    %c177 = arith.constant 177 : index
    %c0_15 = arith.constant 0 : index
    %41 = vector.load %arg2[%c177, %c0_15] : memref<336x128xbf16, #tpu.memory_space<vmem>>, vector<1x128xbf16>
    %42 = arith.extf %41 : vector<1x128xbf16> to vector<1x128xf32>
    %c178 = arith.constant 178 : index
    %c0_16 = arith.constant 0 : index
    %43 = vector.load %arg2[%c178, %c0_16] : memref<336x128xbf16, #tpu.memory_space<vmem>>, vector<1x128xbf16>
    %44 = arith.extf %43 : vector<1x128xbf16> to vector<1x128xf32>
    %45 = arith.truncf %37 : vector<256x128xf32> to vector<256x128xbf16>
    %cst_17 = arith.constant dense<0.000000e+00> : vector<256x128xf32>
    %46 = tpu.matmul %45, %38, %cst_17 {dimension_numbers = #tpu.dot_dimension_numbers<[1], [0], [0], [1], [0, 0, 1, 1], [], []>} : vector<256x128xbf16>, vector<128x128xbf16>, vector<256x128xf32> -> vector<256x128xf32>
    %47 = vector.broadcast %40 : vector<1x128xf32> to vector<256x128xf32>
    %48 = arith.addf %46, %47 : vector<256x128xf32>
    %cst_18 = arith.constant dense<0.000000e+00> : vector<256xf32>
    %49 = vector.multi_reduction <add>, %48, %cst_18 [1] : vector<256x128xf32> to vector<256xf32>
    %50 = vector.shape_cast %49 : vector<256xf32> to vector<256x1xf32>
    %51 = arith.mulf %48, %48 : vector<256x128xf32>
    %cst_19 = arith.constant dense<0.000000e+00> : vector<256xf32>
    %52 = vector.multi_reduction <add>, %51, %cst_19 [1] : vector<256x128xf32> to vector<256xf32>
    %53 = vector.shape_cast %52 : vector<256xf32> to vector<256x1xf32>
    %cst_20 = arith.constant 1.562500e-02 : f32
    %54 = vector.broadcast %cst_20 : f32 to vector<256x1xf32>
    %55 = arith.mulf %50, %54 : vector<256x1xf32>
    %cst_21 = arith.constant 1.562500e-02 : f32
    %56 = vector.broadcast %cst_21 : f32 to vector<256x1xf32>
    %57 = arith.mulf %53, %56 : vector<256x1xf32>
    %58 = arith.mulf %55, %55 : vector<256x1xf32>
    %59 = arith.subf %57, %58 : vector<256x1xf32>
    %cst_22 = arith.constant 0.000000e+00 : f32
    %60 = vector.broadcast %cst_22 : f32 to vector<256x1xf32>
    %61 = arith.maximumf %59, %60 : vector<256x1xf32>
    %62 = vector.broadcast %55 : vector<256x1xf32> to vector<256x128xf32>
    %63 = arith.subf %48, %62 : vector<256x128xf32>
    %cst_23 = arith.constant 9.99999974E-6 : f32
    %64 = vector.broadcast %cst_23 : f32 to vector<256x1xf32>
    %65 = arith.addf %61, %64 : vector<256x1xf32>
    %66 = math.rsqrt %65 : vector<256x1xf32>
    %67 = vector.broadcast %66 : vector<256x1xf32> to vector<256x128xf32>
    %68 = arith.mulf %63, %67 : vector<256x128xf32>
    %69 = vector.broadcast %42 : vector<1x128xf32> to vector<256x128xf32>
    %70 = arith.mulf %68, %69 : vector<256x128xf32>
    %71 = vector.broadcast %44 : vector<1x128xf32> to vector<256x128xf32>
    %72 = arith.addf %70, %71 : vector<256x128xf32>
    %cst_24 = arith.constant 0.000000e+00 : f32
    %73 = vector.broadcast %cst_24 : f32 to vector<256x128xf32>
    %74 = arith.maximumf %72, %73 : vector<256x128xf32>
    %c192 = arith.constant 192 : index
    %c0_25 = arith.constant 0 : index
    %75 = vector.load %arg2[%c192, %c0_25] : memref<336x128xbf16, #tpu.memory_space<vmem>>, vector<128x128xbf16>
    %c320 = arith.constant 320 : index
    %c0_26 = arith.constant 0 : index
    %76 = vector.load %arg2[%c320, %c0_26] : memref<336x128xbf16, #tpu.memory_space<vmem>>, vector<1x128xbf16>
    %77 = arith.extf %76 : vector<1x128xbf16> to vector<1x128xf32>
    %78 = arith.truncf %74 : vector<256x128xf32> to vector<256x128xbf16>
    %cst_27 = arith.constant dense<0.000000e+00> : vector<256x128xf32>
    %79 = tpu.matmul %78, %75, %cst_27 {dimension_numbers = #tpu.dot_dimension_numbers<[1], [0], [0], [1], [0, 0, 1, 1], [], []>} : vector<256x128xbf16>, vector<128x128xbf16>, vector<256x128xf32> -> vector<256x128xf32>
    %80 = vector.broadcast %77 : vector<1x128xf32> to vector<256x128xf32>
    %81 = arith.addf %79, %80 : vector<256x128xf32>
    %c0_28 = arith.constant 0 : index
    %c0_29 = arith.constant 0 : index
    %82 = vector.load %arg3[%c0_28, %c0_29] : memref<256x128xf32, #tpu.memory_space<vmem>>, vector<256x128xf32>
    tpu.vector_store %arg3[%c0_28, %c0_29], %81 {strides = array<i32>} : memref<256x128xf32, #tpu.memory_space<vmem>>, vector<256x128xf32>,
    return
  }
  func.func @transform_0(%arg0: i32) -> (i32, i32) {
    %c0_i32 = arith.constant 0 : i32
    %c0_i32_0 = arith.constant 0 : i32
    return %arg0, %c0_i32 : i32, i32
  }
  func.func @transform_1(%arg0: i32) -> (i32, i32) {
    %c0_i32 = arith.constant 0 : i32
    %c0_i32_0 = arith.constant 0 : i32
    %c0_i32_1 = arith.constant 0 : i32
    return %c0_i32, %c0_i32_0 : i32, i32
  }
  func.func @transform_2(%arg0: i32) -> (i32, i32) {
    %c0_i32 = arith.constant 0 : i32
    %c0_i32_0 = arith.constant 0 : i32
    return %arg0, %c0_i32 : i32, i32
  }
}

</mosaic_0001>

<bundles_post_ra>
// kernel: dqn_forward.1
= control target key start
LH: loop header
LB: loop body
LE: loop exit
PB: predicated region body
PF: predicated region fallthrough
CT: control target
= control target key end

     0   :  { %vm85_vm0 = vcmask 261120   ;;  %s3576_s0 = inlined_call_operand.vmem [shape: f32[256,32], index: 0, kind: input, shape index: {}]   ;;  %s3577_s1 = inlined_call_operand.vmem [shape: bf16[336,128], index: 1, kind: input, shape index: {}]   ;;  %s3578_s2 = inlined_call_operand.hbm [shape: f32[256,128], index: 2, kind: output, shape index: {}]  }
   0x1   :  { %v2182_v0 = vld [vmem:[%s3577_s1] sm:$0xff]   ;;  %v2183_v1 = vld [vmem:[%s3577_s1 + $0x8] sm:$0xff]   ;;  %v15_v7 = vld [vmem:[%s3576_s0 + $0x10] sm:$0xff] }
   0x2   :  { %2043 = vmatprep.subr.bf16.mxu0 %v2182_v0  ;;  %2175 = vmatprep.subr.bf16.mxu1 %v2182_v0  ;;  %v13_v2 = vld [vmem:[%s3576_s0] sm:$0xff]  ;;  %v14_v3 = vld [vmem:[%s3576_s0 + $0x8] sm:$0xff]  ;;  %v16_v8 = vld [vmem:[%s3576_s0 + $0x18] sm:$0xff] }
   0x3   :  { %v29_v4 = vld [vmem:[%s3576_s0 + $0x80] sm:$0xff]  ;;  %2044 = vmatpush3.bf16.msra.mxu0 %v2182_v0  ;;  %2177 = vmatpush3.bf16.msra.mxu1 %v2182_v0  ;;  %v45_v5 = vpack.c.bf16 %v14_v3, %v13_v2  ;;  %v30_v6 = vld [vmem:[%s3576_s0 + $0x88] sm:$0xff]  ;;  %v31_v10 = vld [vmem:[%s3576_s0 + $0x90] sm:$0xff]  ;;  %v46_v14 = vpack.c.bf16 %v16_v8, %v15_v7 }
   0x4   :  { %2045 = vmatprep.subr.bf16.mxu0 %v2183_v1  ;;  %2176 = vmatprep.subr.bf16.mxu1 %v2183_v1  ;;  %v53_v9 = vpack.c.bf16 %v30_v6, %v29_v4  ;;  %v32_v11 = vld [vmem:[%s3576_s0 + $0x98] sm:$0xff]  ;;  %v17_v12 = vld [vmem:[%s3576_s0 + $0x20] sm:$0xff]  ;;  %v18_v13 = vld [vmem:[%s3576_s0 + $0x28] sm:$0xff] }
   0x5   :  { %2047 = vmatprep.mubr.msk.bf16.mxu0 %vm85_vm0, %v45_v5  ;;  %v54_v15 = vpack.c.bf16 %v32_v11, %v31_v10  ;;  %v33_v16 = vld [vmem:[%s3576_s0 + $0xa0] sm:$0xff]  ;;  %v34_v17 = vld [vmem:[%s3576_s0 + $0xa8] sm:$0xff]  ;;  %v47_v18 = vpack.c.bf16 %v18_v13, %v17_v12  ;;  %v19_v20 = vld [vmem:[%s3576_s0 + $0x30] sm:$0xff] }
   0x6   :  { %2063 = vmatprep.mubr.msk.bf16.mxu1 %vm85_vm0, %v53_v9  ;;  %v55_v19 = vpack.c.bf16 %v34_v17, %v33_v16  ;;  %v20_v21 = vld [vmem:[%s3576_s0 + $0x38] sm:$0xff]  ;;  %v35_v22 = vld [vmem:[%s3576_s0 + $0xb0] sm:$0xff]  ;;  %v21_v24 = vld [vmem:[%s3576_s0 + $0x40] sm:$0xff] }
   0x7   :  { %2046 = vmatpush3.bf16.msra.mxu0 %v2183_v1  ;;  %2178 = vmatpush3.bf16.msra.mxu1 %v2183_v1  ;;  %v36_v23 = vld [vmem:[%s3576_s0 + $0xb8] sm:$0xff]  ;;  %v22_v25 = vld [vmem:[%s3576_s0 + $0x48] sm:$0xff]  ;;  %v37_v26 = vld [vmem:[%s3576_s0 + $0xc0] sm:$0xff]  ;;  %v48_v28 = vpack.c.bf16 %v20_v21, %v19_v20 }
   0x8   :  { %v38_v27 = vld [vmem:[%s3576_s0 + $0xc8] sm:$0xff]  ;;  %v56_v29 = vpack.c.bf16 %v36_v23, %v35_v22  ;;  %v49_v30 = vpack.c.bf16 %v22_v25, %v21_v24  ;;  %v23_v32 = vld [vmem:[%s3576_s0 + $0x50] sm:$0xff]  ;;  %v24_v33 = vld [vmem:[%s3576_s0 + $0x58] sm:$0xff] }
   0x9   :  { %v57_v31 = vpack.c.bf16 %v38_v27, %v37_v26  ;;  %v39_v34 = vld [vmem:[%s3576_s0 + $0xd0] sm:$0xff]  ;;  %v40_v35 = vld [vmem:[%s3576_s0 + $0xd8] sm:$0xff]  ;;  %v25_v36 = vld [vmem:[%s3576_s0 + $0x60] sm:$0xff]  ;;  %v50_v40 = vpack.c.bf16 %v24_v33, %v23_v32 }
   0xa   :  { %2048 = vmatmul.mubr.msk.bf16.vlgmr.msra.gmra.mrb[0].mxu0 %vm85_vm0, %v46_v14  ;;  %2064 = vmatmul.mubr.msk.bf16.vlgmr.msra.gmra.mrb[0].mxu1 %vm85_vm0, %v54_v15  ;;  %v26_v37 = vld [vmem:[%s3576_s0 + $0x68] sm:$0xff]  ;;  %v41_v38 = vld [vmem:[%s3576_s0 + $0xe0] sm:$0xff]  ;;  %v58_v41 = vpack.c.bf16 %v40_v35, %v39_v34 }
   0xb   :  { %2051 = vmatprep.mubr.msk.bf16.mxu0 %vm85_vm0, %v47_v18  ;;  %2067 = vmatprep.mubr.msk.bf16.mxu1 %vm85_vm0, %v55_v19  ;;  %v42_v39 = vld [vmem:[%s3576_s0 + $0xe8] sm:$0xff]  ;;  %v51_v42 = vpack.c.bf16 %v26_v37, %v25_v36 }
   0xc   :  { %v59_v43 = vpack.c.bf16 %v42_v39, %v41_v38 }
  0x12   :  { %2052 = vmatmul.mubr.msk.bf16.gmra.mrb[4].mxu0 %vm85_vm0, %v48_v28  ;;  %2068 = vmatmul.mubr.msk.bf16.gmra.mrb[4].mxu1 %vm85_vm0, %v56_v29 }
  0x13   :  { %2055 = vmatprep.mubr.msk.bf16.mxu0 %vm85_vm0, %v49_v30  ;;  %2071 = vmatprep.mubr.msk.bf16.mxu1 %vm85_vm0, %v57_v31 }
  0x14   :  { %7 = vsyncpa [#allocation3], 0  ;;  %v27_v44 = vld [vmem:[%s3576_s0 + $0x70] sm:$0xff]  ;;  %v28_v45 = vld [vmem:[%s3576_s0 + $0x78] sm:$0xff]  ;;  %v69_v50 = vlaneseq }
  0x15   :  { %v43_v46 = vld [vmem:[%s3576_s0 + $0xf0] sm:$0xff]  ;;  %v44_v47 = vld [vmem:[%s3576_s0 + $0xf8] sm:$0xff]  ;;  %v52_v48 = vpack.c.bf16 %v28_v45, %v27_v44 }
  0x16   :  { %v60_v49 = vpack.c.bf16 %v44_v47, %v43_v46  ;;  %v2488_v51 = vshrl.u32 %v69_v50, 7  ;;  %v2493_v52 = vld [vmem:[%s3577_s1 + $0x10] sm:$0x1] }
  0x17   :  { %v3579_v53 = vunpack.c.l.bf16 %v2493_v52 }
  0x18   :  { %3593 = vst [vmem:[#allocation5_spill] sm:$0xff] %v2488_v51  ;;  %v2497_v54 = vsub.s32 0, %v2488_v51 }
  0x1a   :  { %2056 = vmatmul.mubr.msk.bf16.gmra.mrb[8].mxu0 %vm85_vm0, %v50_v40  ;;  %2072 = vmatmul.mubr.msk.bf16.gmra.mrb[8].mxu1 %vm85_vm0, %v58_v41  ;;  %3594 = vst [vmem:[#allocation6_spill] sm:$0xff] %v2497_v54  ;;  %v2502_v55 = vrot.slane %v3579_v53, %v2497_v54 }
  0x1b   :  { %2059 = vmatprep.mubr.msk.bf16.mxu0 %vm85_vm0, %v51_v42  ;;  %2075 = vmatprep.mubr.msk.bf16.mxu1 %vm85_vm0, %v59_v43 }
  0x22   :  { %2060 = vmatmul.mubr.msk.bf16.gmra.mrb[12].mxu0 %vm85_vm0, %v52_v48  ;;  %2076 = vmatmul.mubr.msk.bf16.gmra.mrb[12].mxu1 %vm85_vm0, %v60_v49 }
  0xdd   :  { %v2049_v56 = vpop.f32.mrb[0].mxu0  ;;  %v2065_v57 = vpop.f32.mrb[0].mxu1 }
  0xde   :  { %v2505_v58 = vadd.f32 %v2049_v56, %v2502_v55  ;;  %v2508_v59 = vadd.f32 %v2065_v57, %v2502_v55  ;;  %v168_v60 = vpop.f32.mrb[1].mxu0  ;;  %v232_v61 = vpop.f32.mrb[1].mxu1 }
  0xdf   :  { %v2050_v62 = vpop.f32.mrb[2].mxu0  ;;  %v2066_v63 = vpop.f32.mrb[2].mxu1  ;;  %v2513_v2 = vadd.f32 %v168_v60, %v2502_v55  ;;  %v2523_v6 = vadd.f32 %v232_v61, %v2502_v55 }
  0xe0   :  { %331 = vadd.xlane.f32.xlu0 %v2508_v59  ;;  %v235_v0 = vpop.f32.mrb[3].mxu1  ;;  %299 = vadd.xlane.f32.xlu1 %v2505_v58  ;;  %v171_v1 = vpop.f32.mrb[3].mxu0  ;;  %v2516_v3 = vadd.f32 %v2050_v62, %v2502_v55  ;;  %v2526_v7 = vadd.f32 %v2066_v63, %v2502_v55  ;;  %v361_v15 = vmul.f32 %v2505_v58, %v2505_v58 }
  0xe1   :  { %v2539_v14 = vadd.f32 %v235_v0, %v2502_v55  ;;  %v377_v19 = vmul.f32 %v2508_v59, %v2508_v59  ;;  %v2571_v32 = vadd.f32 %v171_v1, %v2502_v55  ;;  %v359_v37 = vmul.f32 %v2513_v2, %v2513_v2  ;;  %v2184_v1 = vld [vmem:[%s3577_s1 + $0x18] sm:$0xff]  }
  0xe2   :  { %v362_v18 = vmul.f32 %v2516_v3, %v2516_v3  ;;  %v378_v33 = vmul.f32 %v2526_v7, %v2526_v7  ;;  %v375_v60 = vmul.f32 %v2523_v6, %v2523_v6  ;;  %2079 = vmatprep.subr.bf16.mxu1 %v2184_v1 }
  0xe3   :  { %v360_v36 = vmul.f32 %v2571_v32, %v2571_v32  ;;  %v376_v57 = vmul.f32 %v2539_v14, %v2539_v14  ;;  %2080 = vmatpush3.bf16.msra.mxu1 %v2184_v1 }
  0xe4   :  { %301 = vadd.xlane.f32.xlu1 %v2516_v3  ;;  %295 = vadd.xlane.f32.xlu0 %v2513_v2 }
  0xe5   :  { %v2053_v4 = vpop.f32.mrb[4].mxu0  ;;  %v2520_v5 = vpop.f32.mrb[4].mxu1 }
  0xe6   :  { %v2528_v8 = vpop.f32.mrb[5].mxu0  ;;  %v2530_v9 = vpop.f32.mrb[5].mxu1  ;;  %v2609_v61 = vadd.f32 %v2053_v4, %v2502_v55  ;;  %v2618_v63 = vadd.f32 %v2520_v5, %v2502_v55 }
  0xe7   :  { %v2054_v10 = vpop.f32.mrb[6].mxu0  ;;  %v2070_v11 = vpop.f32.mrb[6].mxu1  ;;  %v2630_v4 = vadd.f32 %v2528_v8, %v2502_v55 }
  0xe8   :  { %333 = vadd.xlane.f32.xlu1 %v2526_v7  ;;  %327 = vadd.xlane.f32.xlu0 %v2523_v6  ;;  %v2534_v12 = vpop.f32.mrb[7].mxu0  ;;  %v2536_v13 = vpop.f32.mrb[7].mxu1  ;;  %v2612_v62 = vadd.f32 %v2054_v10, %v2502_v55  ;;  %v2621_v0 = vadd.f32 %v2070_v11, %v2502_v55  ;;  %v2185_v10 = vld [vmem:[%s3577_s1 + $0x20] sm:$0xff]   ;;  %v2643_v11 = vadd.f32 %v2530_v9, %v2502_v55 }
  0xe9   :  { %v2634_v5 = vadd.f32 %v2534_v12, %v2502_v55  ;;  %2081 = vmatprep.subr.bf16.mxu1 %v2185_v10  ;;  %v2647_v8 = vadd.f32 %v2536_v13, %v2502_v55  ;;  %v2186_v12 = vld [vmem:[%s3577_s1 + $0x28] sm:$0xff]   ;;  %v365_v9 = vmul.f32 %v2609_v61, %v2609_v61  ;;  %v2187_v13 = vld [vmem:[%s3577_s1 + $0x30] sm:$0xff]  }
  0xea   :  { %2082 = vmatpush3.bf16.msra.mxu1 %v2185_v10 }
  0xeb   :  { %2083 = vmatprep.subr.bf16.mxu1 %v2186_v12 }
  0xec   :  { %329 = vadd.xlane.f32.xlu1 %v2539_v14  ;;  %395 = vadd.xlane.f32.xlu0 %v361_v15  ;;  %v366_v15 = vmul.f32 %v2612_v62, %v2612_v62 }
  0xed   :  { %v2544_v16 = vpop.f32.mrb[8].mxu0  ;;  %v2073_v17 = vpop.f32.mrb[8].mxu1 }
  0xee   :  { %v200_v20 = vpop.f32.mrb[9].mxu0  ;;  %v2551_v21 = vadd.f32 %v2073_v17, %v2502_v55  ;;  %v264_v22 = vpop.f32.mrb[9].mxu1  ;;  %2084 = vmatpush3.bf16.msra.mxu1 %v2186_v12  ;;  %v364_v17 = vmul.f32 %v2634_v5, %v2634_v5 }
  0xef   :  { %v2554_v23 = vadd.f32 %v200_v20, %v2502_v55  ;;  %v2556_v24 = vpop.f32.mrb[10].mxu0  ;;  %v2559_v25 = vadd.f32 %v264_v22, %v2502_v55  ;;  %v2074_v26 = vpop.f32.mrb[10].mxu1  ;;  %2085 = vmatprep.subr.bf16.mxu1 %v2187_v13  ;;  %v380_v20 = vmul.f32 %v2647_v8, %v2647_v8  ;;  %v379_v22 = vmul.f32 %v2643_v11, %v2643_v11 }
  0xf0   :  { %3595 = vst [vmem:[#allocation7_spill] sm:$0xff] %v2551_v21  ;;  %397 = vadd.xlane.f32.xlu1 %v362_v18  ;;  %427 = vadd.xlane.f32.xlu0 %v377_v19  ;;  %v203_v27 = vpop.f32.mrb[11].mxu0  ;;  %v2562_v28 = vadd.f32 %v2074_v26, %v2502_v55  ;;  %v267_v29 = vpop.f32.mrb[11].mxu1  ;;  %v363_v18 = vmul.f32 %v2630_v4, %v2630_v4  ;;  %v2188_v19 = vld [vmem:[%s3577_s1 + $0x38] sm:$0xff]   ;;  %v2189_v26 = vld [vmem:[%s3577_s1 + $0x40] sm:$0xff]  }
  0xf1   :  { %3596 = vst [vmem:[#allocation8_spill] sm:$0xff] %v2559_v25  ;;  %v2565_v30 = vadd.f32 %v203_v27, %v2502_v55  ;;  %v2568_v31 = vadd.f32 %v267_v29, %v2502_v55  ;;  %v2677_v27 = vadd.f32 %v2544_v16, %v2502_v55  ;;  %v2681_v29 = vadd.f32 %v2556_v24, %v2502_v55  ;;  %v2191_v16 = vld [vmem:[%s3577_s1 + $0x50] sm:$0xff]  }
  0xf2   :  { %3597 = vst [vmem:[#allocation9_spill] sm:$0xff] %v2562_v28  ;;  %2086 = vmatpush3.bf16.msra.mxu1 %v2187_v13 }
  0xf3   :  { %2087 = vmatprep.subr.bf16.mxu1 %v2188_v19  ;;  %v369_v24 = vmul.f32 %v2677_v27, %v2677_v27 }
  0xf4   :  { %429 = vadd.xlane.f32.xlu1 %v378_v33  ;;  %297 = vadd.xlane.f32.xlu0 %v2571_v32  ;;  %v2190_v33 = vld [vmem:[%s3577_s1 + $0x48] sm:$0xff]  }
  0xf5   :  { %v2061_v34 = vpop.f32.mrb[12].mxu0  ;;  %v2077_v35 = vpop.f32.mrb[12].mxu1 }
  0xf6   :  { %v2581_v38 = vadd.f32 %v2061_v34, %v2502_v55  ;;  %v216_v39 = vpop.f32.mrb[13].mxu0  ;;  %v2584_v40 = vadd.f32 %v2077_v35, %v2502_v55  ;;  %v280_v41 = vpop.f32.mrb[13].mxu1  ;;  %2088 = vmatpush3.bf16.msra.mxu1 %v2188_v19  ;;  %v368_v34 = vmul.f32 %v2565_v30, %v2565_v30  ;;  %v367_v35 = vmul.f32 %v2554_v23, %v2554_v23 }
  0xf7   :  { %v2587_v42 = vadd.f32 %v216_v39, %v2502_v55  ;;  %v2062_v43 = vpop.f32.mrb[14].mxu0  ;;  %v2590_v44 = vadd.f32 %v280_v41, %v2502_v55  ;;  %v2078_v45 = vpop.f32.mrb[14].mxu1  ;;  %2089 = vmatprep.subr.bf16.mxu1 %v2189_v26 }
  0xf8   :  { %3598 = vst [vmem:[#allocation10_spill] sm:$0xff] %v2584_v40  ;;  %393 = vadd.xlane.f32.xlu1 %v360_v36  ;;  %391 = vadd.xlane.f32.xlu0 %v359_v37  ;;  %v2593_v46 = vadd.f32 %v2062_v43, %v2502_v55  ;;  %v219_v47 = vpop.f32.mrb[15].mxu0  ;;  %v2596_v48 = vadd.f32 %v2078_v45, %v2502_v55  ;;  %v283_v49 = vpop.f32.mrb[15].mxu1 }
  0xf9   :  { %3599 = vst [vmem:[#allocation11_spill] sm:$0xff] %v2590_v44  ;;  %v2599_v50 = vadd.f32 %v219_v47, %v2502_v55  ;;  %v2602_v56 = vadd.f32 %v283_v49, %v2502_v55  ;;  %v370_v55 = vmul.f32 %v2681_v29, %v2681_v29  ;;  %v373_v37 = vmul.f32 %v2581_v38, %v2581_v38 }
  0xfa   :  { %3600 = vst [vmem:[#allocation12_spill] sm:$0xff] %v2596_v48  ;;  %2090 = vmatpush3.bf16.msra.mxu1 %v2189_v26  ;;  %v374_v36 = vmul.f32 %v2593_v46, %v2593_v46  ;;  %v371_v41 = vmul.f32 %v2587_v42, %v2587_v42  ;;  %v382_v43 = vmul.f32 %v2621_v0, %v2621_v0 }
  0xfb   :  { %3601 = vst [vmem:[#allocation13_spill] sm:$0xff] %v2602_v56  ;;  %2091 = vmatprep.subr.bf16.mxu1 %v2190_v33  ;;  %v372_v39 = vmul.f32 %v2599_v50, %v2599_v50  ;;  %v381_v45 = vmul.f32 %v2618_v63, %v2618_v63  ;;  %v384_v47 = vmul.f32 %v2568_v31, %v2568_v31 }
  0xfc   :  { %425 = vadd.xlane.f32.xlu1 %v376_v57  ;;  %423 = vadd.xlane.f32.xlu0 %v375_v60  ;;  %v383_v49 = vmul.f32 %v2559_v25, %v2559_v25  ;;  %v386_v57 = vmul.f32 %v2562_v28, %v2562_v28  ;;  %v385_v60 = vmul.f32 %v2551_v21, %v2551_v21 }
  0xfd   :  { %v388_v1 = vmul.f32 %v2602_v56, %v2602_v56  ;;  %v387_v10 = vmul.f32 %v2590_v44, %v2590_v44  ;;  %v390_v12 = vmul.f32 %v2596_v48, %v2596_v48 }
  0xfe   :  { %2092 = vmatpush3.bf16.msra.mxu1 %v2190_v33 }
  0xff   :  { %2093 = vmatprep.subr.bf16.mxu1 %v2191_v16 }
 0x100   :  { %309 = vadd.xlane.f32.xlu1 %v2612_v62  ;;  %307 = vadd.xlane.f32.xlu0 %v2609_v61 }
 0x102   :  { %2094 = vmatpush3.bf16.msra.mxu1 %v2191_v16 }
 0x104   :  { %341 = vadd.xlane.f32.xlu1 %v2621_v0  ;;  %339 = vadd.xlane.f32.xlu0 %v2618_v63 }
 0x108   :  { %305 = vadd.xlane.f32.xlu1 %v2634_v5  ;;  %303 = vadd.xlane.f32.xlu0 %v2630_v4 }
 0x10c   :  { %337 = vadd.xlane.f32.xlu1 %v2647_v8  ;;  %335 = vadd.xlane.f32.xlu0 %v2643_v11 }
 0x110   :  { %405 = vadd.xlane.f32.xlu1 %v366_v15  ;;  %403 = vadd.xlane.f32.xlu0 %v365_v9  ;;  %v389_v15 = vmul.f32 %v2584_v40, %v2584_v40 }
 0x114   :  { %401 = vadd.xlane.f32.xlu1 %v364_v17  ;;  %399 = vadd.xlane.f32.xlu0 %v363_v18 }
 0x118   :  { %433 = vadd.xlane.f32.xlu1 %v380_v20  ;;  %431 = vadd.xlane.f32.xlu0 %v379_v22 }
 0x11c   :  { %317 = vadd.xlane.f32.xlu1 %v2681_v29  ;;  %315 = vadd.xlane.f32.xlu0 %v2677_v27 }
 0x120   :  { %313 = vadd.xlane.f32.xlu1 %v2565_v30  ;;  %311 = vadd.xlane.f32.xlu0 %v2554_v23 }
 0x124   :  { %413 = vadd.xlane.f32.xlu1 %v370_v55  ;;  %411 = vadd.xlane.f32.xlu0 %v369_v24 }
 0x128   :  { %409 = vadd.xlane.f32.xlu1 %v368_v34  ;;  %407 = vadd.xlane.f32.xlu0 %v367_v35 }
 0x12c   :  { %325 = vadd.xlane.f32.xlu1 %v2593_v46  ;;  %323 = vadd.xlane.f32.xlu0 %v2581_v38 }
 0x130   :  { %321 = vadd.xlane.f32.xlu1 %v2599_v50  ;;  %319 = vadd.xlane.f32.xlu0 %v2587_v42 }
 0x134   :  { %421 = vadd.xlane.f32.xlu1 %v374_v36  ;;  %419 = vadd.xlane.f32.xlu0 %v373_v37 }
 0x138   :  { %417 = vadd.xlane.f32.xlu1 %v372_v39  ;;  %415 = vadd.xlane.f32.xlu0 %v371_v41 }
 0x13c   :  { %437 = vadd.xlane.f32.xlu1 %v382_v43  ;;  %435 = vadd.xlane.f32.xlu0 %v381_v45 }
 0x140   :  { %345 = vadd.xlane.f32.xlu1 %v2568_v31  ;;  %343 = vadd.xlane.f32.xlu0 %v2559_v25 }
 0x144   :  { %349 = vadd.xlane.f32.xlu1 %v2562_v28  ;;  %347 = vadd.xlane.f32.xlu0 %v2551_v21 }
 0x148   :  { %441 = vadd.xlane.f32.xlu1 %v384_v47  ;;  %439 = vadd.xlane.f32.xlu0 %v383_v49 }
 0x14c   :  { %445 = vadd.xlane.f32.xlu1 %v386_v57  ;;  %443 = vadd.xlane.f32.xlu0 %v385_v60 }
 0x150   :  { %353 = vadd.xlane.f32.xlu1 %v2602_v56  ;;  %351 = vadd.xlane.f32.xlu0 %v2590_v44 }
 0x154   :  { %357 = vadd.xlane.f32.xlu1 %v2596_v48  ;;  %355 = vadd.xlane.f32.xlu0 %v2584_v40 }
 0x158   :  { %449 = vadd.xlane.f32.xlu1 %v388_v1  ;;  %447 = vadd.xlane.f32.xlu0 %v387_v10 }
 0x15c   :  { %453 = vadd.xlane.f32.xlu1 %v390_v12  ;;  %451 = vadd.xlane.f32.xlu0 %v389_v15 }
 0x16d   :  { %v332_v9 = vpop.xlane.xlu0 %331  ;;  %v300_v13 = vpop.xlane.xlu1 %299 }
 0x16e   :  { %v457_v22 = vmul.f32 0.0078125, %v300_v13 }
 0x170   :  { %v521_v16 = vmul.f32 %v457_v22, %v457_v22 }
 0x171   :  { %v302_v17 = vpop.xlane.xlu1 %301  ;;  %v296_v18 = vpop.xlane.xlu0 %295 }
 0x172   :  { %v458_v55 = vmul.f32 0.0078125, %v302_v17  ;;  %v455_v45 = vmul.f32 0.0078125, %v296_v18 }
 0x174   :  { %v522_v37 = vmul.f32 %v458_v55, %v458_v55  ;;  %v519_v12 = vmul.f32 %v455_v45, %v455_v45 }
 0x175   :  { %v2741_v19 = vpop.xlane.xlu1 %333  ;;  %v2743_v20 = vpop.xlane.xlu0 %327 }
 0x179   :  { %v2745_v26 = vpop.xlane.xlu1 %329  ;;  %v396_v33 = vpop.xlane.xlu0 %395 }
 0x17a   :  { %v489_v24 = vmul.f32 0.0078125, %v396_v33 }
 0x17c   :  { %v553_v34 = vsub.f32 %v489_v24, %v521_v16 }
 0x17d   :  { %v398_v35 = vpop.xlane.xlu1 %397  ;;  %v428_v36 = vpop.xlane.xlu0 %427 }
 0x17e   :  { %v490_v39 = vmul.f32 0.0078125, %v398_v35  ;;  %v585_v41 = vmax.f32 %v553_v34, 0.0 }
 0x180   :  { %v554_v43 = vsub.f32 %v490_v39, %v522_v37  ;;  %v649_v60 = vadd.f32 1e-05, %v585_v41 }
 0x181   :  { %v2747_v47 = vpop.xlane.xlu1 %429  ;;  %v298_v49 = vpop.xlane.xlu0 %297 }
 0x182   :  { %v586_v57 = vmax.f32 %v554_v43, 0.0  ;;  %v456_v1 = vmul.f32 0.0078125, %v298_v49 }
 0x184   :  { %v650_v10 = vadd.f32 1e-05, %v586_v57  ;;  %v520_v17 = vmul.f32 %v456_v1, %v456_v1 }
 0x185   :  { %v394_v15 = vpop.xlane.xlu1 %393  ;;  %v392_v13 = vpop.xlane.xlu0 %391 }
 0x186   :  { %2200 = vrsqrt.f32 %v650_v10  ;;  %v488_v33 = vmul.f32 0.0078125, %v394_v15  ;;  %v487_v16 = vmul.f32 0.0078125, %v392_v13  ;;  %v3583_v10 = vsub.s32 1, %v2488_v51 }
 0x187   :  { %2202 = vrsqrt.f32 %v649_v60  ;;  %v67_v60 = vld [vmem:[%s3577_s1 + $0x10] sm:$0x2]  ;;  %v618_v15 = vsub.f32 %v2516_v3, %v458_v55  ;;  %v2770_v3 = vmul.f32 0.0078125, %v332_v9  ;;  %v616_v55 = vsub.f32 %v2571_v32, %v456_v1 }
 0x188   :  { %v552_v24 = vsub.f32 %v488_v33, %v520_v17  ;;  %v551_v35 = vsub.f32 %v487_v16, %v519_v12  ;;  %v617_v33 = vsub.f32 %v2505_v58, %v457_v22 }
 0x189   :  { %v2749_v34 = vpop.xlane.xlu1 %425  ;;  %v2751_v18 = vpop.xlane.xlu0 %423  ;;  %v537_v1 = vmul.f32 %v2770_v3, %v2770_v3 }
 0x18a   :  { %v584_v37 = vmax.f32 %v552_v24, 0.0  ;;  %v583_v39 = vmax.f32 %v551_v35, 0.0  ;;  %v68_v24 = vunpack.c.l.bf16 %v67_v60  ;;  %v3582_v35 = vsub.s32 2, %v2488_v51 }
 0x18b   :  { %v615_v60 = vsub.f32 %v2513_v2, %v455_v45 }
 0x18c   :  { %v648_v43 = vadd.f32 1e-05, %v584_v37  ;;  %v647_v41 = vadd.f32 1e-05, %v583_v39  ;;  %v3602_v37 = vunpack.c.l.bf16 %v2493_v52  ;;  %v2775_v58 = vrot.slane %v68_v24, %v3582_v35 }
 0x18d   :  { %v310_v49 = vpop.xlane.xlu1 %309  ;;  %v308_v57 = vpop.xlane.xlu0 %307  ;;  %v2780_v52 = vmul.f32 0.0078125, %v2741_v19  ;;  %v2794_v19 = vmul.f32 0.0078125, %v2743_v20 }
 0x18e   :  { %2204 = vrsqrt.f32 %v648_v43  ;;  %v2768_v39 = vrot.slane %v3602_v37, %v3583_v10  ;;  %v2789_v24 = vmul.f32 0.0078125, %v310_v49 }
 0x18f   :  { %2206 = vrsqrt.f32 %v647_v41 }
 0x190   :  { %v2201_v53 = vpop.eup %2200 }
 0x191   :  { %v2203_v12 = vpop.eup %2202  ;;  %v2758_v13 = vpop.xlane.xlu1 %341  ;;  %v714_v16 = vmul.f32 %v2201_v53, %v618_v15  ;;  %v505_v15 = vmul.f32 0.0078125, %v428_v36 }
 0x192   :  { %v2760_v17 = vpop.xlane.xlu0 %339  ;;  %v713_v43 = vmul.f32 %v2203_v12, %v617_v33 }
 0x193   :  { %v750_v53 = vmul.f32 %v2768_v39, %v714_v16  ;;  %v2791_v16 = vmul.f32 0.0078125, %v308_v57  ;;  %v569_v35 = vsub.f32 %v505_v15, %v537_v1 }
 0x194   :  { %v749_v12 = vmul.f32 %v2768_v39, %v713_v43  ;;  %v538_v43 = vmul.f32 %v2780_v52, %v2780_v52 }
 0x195   :  { %v306_v41 = vpop.xlane.xlu1 %305  ;;  %v786_v45 = vadd.f32 %v2775_v58, %v750_v53  ;;  %v526_v53 = vmul.f32 %v2789_v24, %v2789_v24  ;;  %v525_v15 = vmul.f32 %v2791_v16, %v2791_v16  ;;  %v601_v51 = vmax.f32 %v569_v35, 0.0 }
 0x196   :  { %v304_v54 = vpop.xlane.xlu0 %303  ;;  %v2802_v49 = vmul.f32 0.0078125, %v306_v41  ;;  %v503_v35 = vmul.f32 0.0078125, %v2751_v18 }
 0x197   :  { %v2804_v57 = vmul.f32 0.0078125, %v304_v54  ;;  %v818_v10 = vmax.f32 %v786_v45, 0.0  ;;  %v504_v45 = vmul.f32 0.0078125, %v2749_v34  ;;  %v665_v18 = vadd.f32 1e-05, %v601_v51 }
 0x198   :  { %v2205_v22 = vpop.eup %2204  ;;  %v633_v51 = vsub.f32 %v2508_v59, %v2770_v3  ;;  %v621_v59 = vsub.f32 %v2609_v61, %v2791_v16  ;;  %v620_v3 = vsub.f32 %v2634_v5, %v2802_v49 }
 0x199   :  { %v2207_v33 = vpop.eup %2206  ;;  %v2783_v9 = vpop.xlane.xlu1 %337  ;;  %v712_v32 = vmul.f32 %v2205_v22, %v616_v55  ;;  %v506_v55 = vmul.f32 0.0078125, %v2747_v47  ;;  %v785_v22 = vadd.f32 %v2775_v58, %v749_v12  ;;  %v2813_v12 = vmul.f32 0.0078125, %v2745_v26 }
 0x19a   :  { %v2785_v37 = vpop.xlane.xlu0 %335  ;;  %v711_v2 = vmul.f32 %v2207_v33, %v615_v60  ;;  %v523_v44 = vmul.f32 %v2804_v57, %v2804_v57  ;;  %v619_v5 = vsub.f32 %v2630_v4, %v2804_v57 }
 0x19b   :  { %v748_v36 = vmul.f32 %v2768_v39, %v712_v32  ;;  %v570_v40 = vsub.f32 %v506_v55, %v538_v43  ;;  %v817_v21 = vmax.f32 %v785_v22, 0.0 }
 0x19c   :  { %v747_v20 = vmul.f32 %v2768_v39, %v711_v2 }
 0x19d   :  { %v406_v60 = vpop.xlane.xlu1 %405  ;;  %v784_v32 = vadd.f32 %v2775_v58, %v748_v36  ;;  %v524_v36 = vmul.f32 %v2802_v49, %v2802_v49  ;;  %v868_v55 = vpack.c.bf16 %v818_v10, %v817_v21  ;;  %v2862_v49 = vmul.f32 0.0078125, %v2785_v37 }
 0x19e   :  { %v404_v33 = vpop.xlane.xlu0 %403  ;;  %v494_v1 = vmul.f32 0.0078125, %v406_v60  ;;  %v783_v54 = vadd.f32 %v2775_v58, %v747_v20 }
 0x19f   :  { %v493_v47 = vmul.f32 0.0078125, %v404_v33  ;;  %v816_v41 = vmax.f32 %v784_v32, 0.0 }
 0x1a0   :  { %v558_v2 = vsub.f32 %v494_v1, %v526_v53  ;;  %v815_v33 = vmax.f32 %v783_v54, 0.0 }
 0x1a1   :  { %v557_v48 = vsub.f32 %v493_v47, %v525_v15  ;;  %v402_v56 = vpop.xlane.xlu1 %401  ;;  %v535_v47 = vmul.f32 %v2794_v19, %v2794_v19 }
 0x1a2   :  { %v400_v60 = vpop.xlane.xlu0 %399  ;;  %v590_v26 = vmax.f32 %v558_v2, 0.0  ;;  %v492_v25 = vmul.f32 0.0078125, %v402_v56  ;;  %v867_v43 = vpack.c.bf16 %v816_v41, %v815_v33  ;;  %v602_v41 = vmax.f32 %v570_v40, 0.0 }
 0x1a3   :  { %v589_v28 = vmax.f32 %v557_v48, 0.0  ;;  %v491_v20 = vmul.f32 0.0078125, %v400_v60  ;;  %v536_v48 = vmul.f32 %v2813_v12, %v2813_v12  ;;  %v634_v40 = vsub.f32 %v2526_v7, %v2780_v52 }
 0x1a4   :  { %v654_v32 = vadd.f32 1e-05, %v590_v26  ;;  %v556_v15 = vsub.f32 %v492_v25, %v524_v36  ;;  %2095 = vmatprep.mubr.bf16.mxu1 %v867_v43  ;;  %v666_v36 = vadd.f32 1e-05, %v602_v41 }
 0x1a5   :  { %v653_v53 = vadd.f32 1e-05, %v589_v28  ;;  %v555_v1 = vsub.f32 %v491_v20, %v523_v44  ;;  %v434_v54 = vpop.xlane.xlu1 %433  ;;  %2096 = vmatmul.mubr.bf16.vlgmr.msra.gmra.mrb[16].mxu1 %v868_v55  ;;  %v568_v21 = vsub.f32 %v504_v45, %v536_v48  ;;  %v567_v28 = vsub.f32 %v503_v35, %v535_v47 }
 0x1a6   :  { %v432_v22 = vpop.xlane.xlu0 %431  ;;  %2208 = vrsqrt.f32 %v654_v32  ;;  %v588_v56 = vmax.f32 %v556_v15, 0.0  ;;  %v631_v35 = vsub.f32 %v2523_v6, %v2794_v19  ;;  %v622_v55 = vsub.f32 %v2612_v62, %v2789_v24 }
 0x1a7   :  { %v587_v34 = vmax.f32 %v555_v1, 0.0  ;;  %2210 = vrsqrt.f32 %v653_v53  ;;  %v600_v60 = vmax.f32 %v568_v21, 0.0  ;;  %v599_v33 = vmax.f32 %v567_v28, 0.0 }
 0x1a8   :  { %v652_v25 = vadd.f32 1e-05, %v588_v56  ;;  %v2839_v32 = vmul.f32 0.0078125, %v2783_v9 }
 0x1a9   :  { %v651_v44 = vadd.f32 1e-05, %v587_v34  ;;  %v318_v10 = vpop.xlane.xlu1 %317  ;;  %v2841_v15 = vadd.f32 1e-05, %v600_v60  ;;  %v2843_v1 = vadd.f32 1e-05, %v599_v33 }
 0x1aa   :  { %v316_v2 = vpop.xlane.xlu0 %315  ;;  %2212 = vrsqrt.f32 %v652_v25  ;;  %v2826_v26 = vmul.f32 0.0078125, %v318_v10  ;;  %v540_v16 = vmul.f32 %v2839_v32, %v2839_v32  ;;  %v507_v33 = vmul.f32 0.0078125, %v432_v22 }
 0x1ab   :  { %2214 = vrsqrt.f32 %v651_v44  ;;  %v2832_v45 = vmul.f32 0.0078125, %v316_v2  ;;  %v508_v44 = vmul.f32 0.0078125, %v434_v54 }
 0x1ac   :  { %2216 = vrsqrt.f32 %v665_v18  ;;  %v530_v48 = vmul.f32 %v2826_v26, %v2826_v26 }
 0x1ad   :  { %v314_v20 = vpop.xlane.xlu1 %313  ;;  %2218 = vrsqrt.f32 %v666_v36  ;;  %v529_v18 = vmul.f32 %v2832_v45, %v2832_v45 }
 0x1ae   :  { %v312_v43 = vpop.xlane.xlu0 %311  ;;  %v2851_v56 = vmul.f32 0.0078125, %v314_v20 }
 0x1af   :  { %v2853_v62 = vmul.f32 0.0078125, %v312_v43 }
 0x1b0   :  { %v2209_v53 = vpop.eup %2208  ;;  %v528_v20 = vmul.f32 %v2851_v56, %v2851_v56 }
 0x1b1   :  { %v2211_v47 = vpop.eup %2210  ;;  %v414_v9 = vpop.xlane.xlu1 %413  ;;  %v718_v34 = vmul.f32 %v2209_v53, %v622_v55  ;;  %v527_v4 = vmul.f32 %v2853_v62, %v2853_v62 }
 0x1b2   :  { %v412_v24 = vpop.xlane.xlu0 %411  ;;  %v498_v41 = vmul.f32 0.0078125, %v414_v9  ;;  %v717_v61 = vmul.f32 %v2211_v47, %v621_v59 }
 0x1b3   :  { %v497_v21 = vmul.f32 0.0078125, %v412_v24  ;;  %v754_v28 = vmul.f32 %v2768_v39, %v718_v34 }
 0x1b4   :  { %v2213_v25 = vpop.eup %2212  ;;  %v562_v10 = vsub.f32 %v498_v41, %v530_v48  ;;  %v753_v36 = vmul.f32 %v2768_v39, %v717_v61 }
 0x1b5   :  { %v561_v2 = vsub.f32 %v497_v21, %v529_v18  ;;  %v2215_v60 = vpop.eup %2214  ;;  %v410_v57 = vpop.xlane.xlu1 %409  ;;  %v716_v37 = vmul.f32 %v2213_v25, %v620_v3  ;;  %v790_v22 = vadd.f32 %v2775_v58, %v754_v28  ;;  %v539_v3 = vmul.f32 %v2862_v49, %v2862_v49 }
 0x1b6   :  { %v408_v43 = vpop.xlane.xlu0 %407  ;;  %v2217_v55 = vpop.eup %2216  ;;  %v594_v53 = vmax.f32 %v562_v10, 0.0  ;;  %v496_v47 = vmul.f32 0.0078125, %v410_v57  ;;  %v715_v48 = vmul.f32 %v2215_v60, %v619_v5  ;;  %v789_v24 = vadd.f32 %v2775_v58, %v753_v36 }
 0x1b7   :  { %v593_v59 = vmax.f32 %v561_v2, 0.0  ;;  %v495_v54 = vmul.f32 0.0078125, %v408_v43  ;;  %v752_v9 = vmul.f32 %v2768_v39, %v716_v37  ;;  %v2219_v61 = vpop.eup %2218  ;;  %v729_v60 = vmul.f32 %v2217_v55, %v633_v51 }
 0x1b8   :  { %v658_v34 = vadd.f32 1e-05, %v594_v53  ;;  %v560_v41 = vsub.f32 %v496_v47, %v528_v20  ;;  %v751_v2 = vmul.f32 %v2768_v39, %v715_v48  ;;  %v572_v57 = vsub.f32 %v508_v44, %v540_v16 }
 0x1b9   :  { %v657_v18 = vadd.f32 1e-05, %v593_v59  ;;  %v559_v21 = vsub.f32 %v495_v54, %v527_v4  ;;  %v326_v25 = vpop.xlane.xlu1 %325  ;;  %v788_v5 = vadd.f32 %v2775_v58, %v752_v9  ;;  %v571_v28 = vsub.f32 %v507_v33, %v539_v3 }
 0x1ba   :  { %v324_v10 = vpop.xlane.xlu0 %323  ;;  %2220 = vrsqrt.f32 %v658_v34  ;;  %v592_v36 = vmax.f32 %v560_v41, 0.0  ;;  %v787_v20 = vadd.f32 %v2775_v58, %v751_v2  ;;  %v821_v59 = vmax.f32 %v789_v24, 0.0 }
 0x1bb   :  { %v591_v43 = vmax.f32 %v559_v21, 0.0  ;;  %2222 = vrsqrt.f32 %v657_v18  ;;  %v820_v4 = vmax.f32 %v788_v5, 0.0  ;;  %v822_v47 = vmax.f32 %v790_v22, 0.0 }
 0x1bc   :  { %v656_v37 = vadd.f32 1e-05, %v592_v36  ;;  %v632_v54 = vsub.f32 %v2539_v14, %v2813_v12  ;;  %2224 = vrsqrt.f32 %v2841_v15  ;;  %v2882_v51 = vmul.f32 0.0078125, %v2758_v13 }
 0x1bd   :  { %v655_v53 = vadd.f32 1e-05, %v591_v43  ;;  %v322_v16 = vpop.xlane.xlu1 %321  ;;  %v819_v55 = vmax.f32 %v787_v20, 0.0  ;;  %v2885_v33 = vmul.f32 0.0078125, %v2760_v17  ;;  %v2887_v48 = vmul.f32 0.0078125, %v326_v25 }
 0x1be   :  { %v320_v44 = vpop.xlane.xlu0 %319  ;;  %2226 = vrsqrt.f32 %v656_v37  ;;  %v2889_v9 = vmul.f32 0.0078125, %v324_v10  ;;  %v604_v24 = vmax.f32 %v572_v57, 0.0  ;;  %v730_v15 = vmul.f32 %v2219_v61, %v634_v40 }
 0x1bf   :  { %2228 = vrsqrt.f32 %v655_v53  ;;  %v869_v22 = vpack.c.bf16 %v820_v4, %v819_v55  ;;  %v603_v13 = vmax.f32 %v571_v28, 0.0  ;;  %v870_v34 = vpack.c.bf16 %v822_v47, %v821_v59 }
 0x1c0   :  { %2230 = vrsqrt.f32 %v2843_v1  ;;  %v765_v18 = vmul.f32 %v2768_v39, %v729_v60  ;;  %v2898_v17 = vmul.f32 %v2882_v51, %v2882_v51  ;;  %v638_v41 = vsub.f32 %v2621_v0, %v2882_v51 }
 0x1c1   :  { %v2902_v21 = vmul.f32 0.0078125, %v322_v16  ;;  %v2904_v3 = vmul.f32 0.0078125, %v320_v44  ;;  %2099 = vmatprep.mubr.bf16.mxu1 %v869_v22  ;;  %v422_v7 = vpop.xlane.xlu1 %421  ;;  %v534_v40 = vmul.f32 %v2887_v48, %v2887_v48  ;;  %v533_v1 = vmul.f32 %v2889_v9, %v2889_v9 }
 0x1c2   :  { %v420_v52 = vpop.xlane.xlu0 %419  ;;  %2100 = vmatmul.mubr.bf16.gmra.mrb[20].mxu1 %v870_v34  ;;  %v502_v61 = vmul.f32 0.0078125, %v422_v7  ;;  %v541_v10 = vmul.f32 %v2885_v33, %v2885_v33  ;;  %v668_v2 = vadd.f32 1e-05, %v604_v24  ;;  %v626_v5 = vsub.f32 %v2681_v29, %v2826_v26 }
 0x1c3   :  { %v501_v25 = vmul.f32 0.0078125, %v420_v52  ;;  %v2915_v60 = vmul.f32 %v2768_v39, %v730_v15  ;;  %v667_v36 = vadd.f32 1e-05, %v603_v13  ;;  %v2918_v20 = vadd.f32 %v2775_v58, %v765_v18 }
 0x1c4   :  { %v2221_v57 = vpop.eup %2220  ;;  %v566_v43 = vsub.f32 %v502_v61, %v534_v40  ;;  %v625_v37 = vsub.f32 %v2677_v27, %v2832_v45  ;;  %v532_v53 = vmul.f32 %v2902_v21, %v2902_v21  ;;  %v531_v29 = vmul.f32 %v2904_v3, %v2904_v3 }
 0x1c5   :  { %v565_v28 = vsub.f32 %v501_v25, %v533_v1  ;;  %v2223_v4 = vpop.eup %2222  ;;  %v418_v26 = vpop.xlane.xlu1 %417  ;;  %v722_v47 = vmul.f32 %v2221_v57, %v626_v5  ;;  %2232 = vrsqrt.f32 %v668_v2  ;;  %v624_v15 = vsub.f32 %v2565_v30, %v2851_v56 }
 0x1c6   :  { %v416_v59 = vpop.xlane.xlu0 %415  ;;  %v598_v16 = vmax.f32 %v566_v43, 0.0  ;;  %v500_v55 = vmul.f32 0.0078125, %v418_v26  ;;  %v2225_v22 = vpop.eup %2224  ;;  %v721_v13 = vmul.f32 %v2223_v4, %v625_v37  ;;  %2234 = vrsqrt.f32 %v667_v36 }
 0x1c7   :  { %v597_v44 = vmax.f32 %v565_v28, 0.0  ;;  %v499_v24 = vmul.f32 0.0078125, %v416_v59  ;;  %v758_v27 = vmul.f32 %v2768_v39, %v722_v47  ;;  %v623_v1 = vsub.f32 %v2554_v23, %v2853_v62 }
 0x1c8   :  { %v2227_v45 = vpop.eup %2226  ;;  %v662_v34 = vadd.f32 1e-05, %v598_v16  ;;  %v564_v7 = vsub.f32 %v500_v55, %v532_v53  ;;  %v757_v2 = vmul.f32 %v2768_v39, %v721_v13  ;;  %v833_v6 = vmax.f32 %v2918_v20, 0.0 }
 0x1c9   :  { %v661_v18 = vadd.f32 1e-05, %v597_v44  ;;  %v563_v52 = vsub.f32 %v499_v24, %v531_v29  ;;  %v2229_v40 = vpop.eup %2228  ;;  %v438_v61 = vpop.xlane.xlu1 %437  ;;  %v720_v5 = vmul.f32 %v2227_v45, %v624_v15  ;;  %v794_v23 = vadd.f32 %v2775_v58, %v758_v27 }
 0x1ca   :  { %v436_v25 = vpop.xlane.xlu0 %435  ;;  %v2231_v57 = vpop.eup %2230  ;;  %2236 = vrsqrt.f32 %v662_v34  ;;  %v596_v30 = vmax.f32 %v564_v7, 0.0  ;;  %v510_v43 = vmul.f32 0.0078125, %v438_v61  ;;  %v719_v4 = vmul.f32 %v2229_v40, %v623_v1 }
 0x1cb   :  { %v595_v56 = vmax.f32 %v563_v52, 0.0  ;;  %2238 = vrsqrt.f32 %v661_v18  ;;  %v509_v28 = vmul.f32 0.0078125, %v436_v25  ;;  %v756_v37 = vmul.f32 %v2768_v39, %v720_v5 }
 0x1cc   :  { %v660_v53 = vadd.f32 1e-05, %v596_v30  ;;  %v574_v29 = vsub.f32 %v510_v43, %v2898_v17  ;;  %v755_v47 = vmul.f32 %v2768_v39, %v719_v4  ;;  %v793_v44 = vadd.f32 %v2775_v58, %v757_v2 }
 0x1cd   :  { %v659_v36 = vadd.f32 1e-05, %v595_v56  ;;  %v573_v62 = vsub.f32 %v509_v28, %v541_v10  ;;  %v346_v26 = vpop.xlane.xlu1 %345  ;;  %v792_v16 = vadd.f32 %v2775_v58, %v756_v37  ;;  %v727_v24 = vmul.f32 %v2231_v57, %v631_v35 }
 0x1ce   :  { %v344_v59 = vpop.xlane.xlu0 %343  ;;  %2240 = vrsqrt.f32 %v660_v53  ;;  %v606_v55 = vmax.f32 %v574_v29, 0.0  ;;  %v728_v17 = vmul.f32 %v2225_v22, %v632_v54  ;;  %v791_v15 = vadd.f32 %v2775_v58, %v755_v47 }
 0x1cf   :  { %2242 = vrsqrt.f32 %v659_v36  ;;  %v605_v10 = vmax.f32 %v573_v62, 0.0  ;;  %v824_v13 = vmax.f32 %v792_v16, 0.0  ;;  %v637_v27 = vsub.f32 %v2618_v63, %v2885_v33  ;;  %v2233_v19 = vpop.eup %2232 }
 0x1d0   :  { %v826_v45 = vmax.f32 %v794_v23, 0.0  ;;  %v2949_v34 = vadd.f32 %v2775_v58, %v2915_v60  ;;  %v636_v14 = vsub.f32 %v2647_v8, %v2839_v32  ;;  %v670_v12 = vadd.f32 1e-05, %v606_v55  ;;  %v2235_v60 = vpop.eup %2234 }
 0x1d1   :  { %v350_v35 = vpop.xlane.xlu1 %349  ;;  %v823_v22 = vmax.f32 %v791_v15, 0.0  ;;  %v825_v18 = vmax.f32 %v793_v44, 0.0  ;;  %v635_v7 = vsub.f32 %v2643_v11, %v2862_v49  ;;  %v669_v52 = vadd.f32 1e-05, %v605_v10 }
 0x1d2   :  { %v348_v54 = vpop.xlane.xlu0 %347  ;;  %v2956_v40 = vmul.f32 0.0078125, %v346_v26  ;;  %v2958_v1 = vmul.f32 0.0078125, %v344_v59  ;;  %v630_v61 = vsub.f32 %v2593_v46, %v2887_v48  ;;  %v763_v8 = vmul.f32 %v2768_v39, %v727_v24 }
 0x1d3   :  { %v871_v25 = vpack.c.bf16 %v824_v13, %v823_v22  ;;  %v764_v32 = vmul.f32 %v2768_v39, %v728_v17  ;;  %v629_v2 = vsub.f32 %v2581_v38, %v2889_v9  ;;  %v872_v57 = vpack.c.bf16 %v826_v45, %v825_v18 }
 0x1d4   :  { %v2237_v5 = vpop.eup %2236  ;;  %v544_v11 = vmul.f32 %v2956_v40, %v2956_v40  ;;  %v543_v49 = vmul.f32 %v2958_v1, %v2958_v1  ;;  %2244 = vrsqrt.f32 %v670_v12  ;;  %v2970_v56 = vmul.f32 0.0078125, %v350_v35 }
 0x1d5   :  { %v2239_v30 = vpop.eup %2238  ;;  %v2972_v46 = vmul.f32 0.0078125, %v348_v54  ;;  %2103 = vmatprep.mubr.bf16.mxu1 %v871_v25  ;;  %v442_v48 = vpop.xlane.xlu1 %441  ;;  %v726_v28 = vmul.f32 %v2237_v5, %v630_v61  ;;  %2246 = vrsqrt.f32 %v669_v52  ;;  %v628_v37 = vsub.f32 %v2599_v50, %v2902_v21 }
 0x1d6   :  { %v440_v43 = vpop.xlane.xlu0 %439  ;;  %2104 = vmatmul.mubr.bf16.gmra.mrb[24].mxu1 %v872_v57  ;;  %v512_v38 = vmul.f32 0.0078125, %v442_v48  ;;  %v725_v4 = vmul.f32 %v2239_v30, %v629_v2  ;;  %v546_v53 = vmul.f32 %v2970_v56, %v2970_v56  ;;  %v2980_v29 = vadd.f32 %v2775_v58, %v764_v32 }
 0x1d7   :  { %v511_v9 = vmul.f32 0.0078125, %v440_v43  ;;  %v762_v36 = vmul.f32 %v2768_v39, %v726_v28  ;;  %v545_v62 = vmul.f32 %v2972_v46, %v2972_v46  ;;  %v627_v50 = vsub.f32 %v2587_v42, %v2904_v3 }
 0x1d8   :  { %v2241_v23 = vpop.eup %2240  ;;  %v576_v26 = vsub.f32 %v512_v38, %v544_v11  ;;  %v761_v47 = vmul.f32 %v2768_v39, %v725_v4  ;;  %v731_v24 = vmul.f32 %v2235_v60, %v635_v7  ;;  %v732_v17 = vmul.f32 %v2233_v19, %v636_v14 }
 0x1d9   :  { %v575_v59 = vsub.f32 %v511_v9, %v543_v49  ;;  %v2243_v16 = vpop.eup %2242  ;;  %v446_v21 = vpop.xlane.xlu1 %445  ;;  %v724_v55 = vmul.f32 %v2241_v23, %v628_v37  ;;  %v798_v22 = vadd.f32 %v2775_v58, %v762_v36  ;;  %v799_v14 = vadd.f32 %v2775_v58, %v763_v8 }
 0x1da   :  { %v444_v44 = vpop.xlane.xlu0 %443  ;;  %v608_v10 = vmax.f32 %v576_v26, 0.0  ;;  %v514_v13 = vmul.f32 0.0078125, %v446_v21  ;;  %v723_v12 = vmul.f32 %v2243_v16, %v627_v50  ;;  %v797_v54 = vadd.f32 %v2775_v58, %v761_v47 }
 0x1db   :  { %v607_v15 = vmax.f32 %v575_v59, 0.0  ;;  %v513_v45 = vmul.f32 0.0078125, %v444_v44  ;;  %v760_v35 = vmul.f32 %v2768_v39, %v724_v55  ;;  %v768_v60 = vmul.f32 %v2768_v39, %v732_v17 }
 0x1dc   :  { %v672_v18 = vadd.f32 1e-05, %v608_v10  ;;  %v578_v61 = vsub.f32 %v514_v13, %v546_v53  ;;  %v759_v7 = vmul.f32 %v2768_v39, %v723_v12  ;;  %v767_v2 = vmul.f32 %v2768_v39, %v731_v24 }
 0x1dd   :  { %v671_v52 = vadd.f32 1e-05, %v607_v15  ;;  %v577_v42 = vsub.f32 %v513_v45, %v545_v62  ;;  %v354_v3 = vpop.xlane.xlu1 %353  ;;  %v796_v19 = vadd.f32 %v2775_v58, %v760_v35  ;;  %v834_v30 = vmax.f32 %v2949_v34, 0.0 }
 0x1de   :  { %v352_v25 = vpop.xlane.xlu0 %351  ;;  %2248 = vrsqrt.f32 %v672_v18  ;;  %v610_v32 = vmax.f32 %v578_v61, 0.0  ;;  %v2245_v11 = vpop.eup %2244  ;;  %v795_v49 = vadd.f32 %v2775_v58, %v759_v7  ;;  %v829_v38 = vmax.f32 %v797_v54, 0.0 }
 0x1df   :  { %v609_v5 = vmax.f32 %v577_v42, 0.0  ;;  %2250 = vrsqrt.f32 %v671_v52  ;;  %v828_v57 = vmax.f32 %v796_v19, 0.0  ;;  %v2247_v48 = vpop.eup %2246  ;;  %v830_v9 = vmax.f32 %v798_v22, 0.0  ;;  %v3603_v22 = vld [vmem:[#allocation8_spill] sm:$0xff]  ;;  %v3605_v52 = vld [vmem:[#allocation7_spill] sm:$0xff] }
 0x1e0   :  { %v674_v43 = vadd.f32 1e-05, %v610_v32  ;;  %v827_v37 = vmax.f32 %v795_v49, 0.0  ;;  %v831_v53 = vmax.f32 %v799_v14, 0.0  ;;  %v832_v36 = vmax.f32 %v2980_v29, 0.0 }
 0x1e1   :  { %v673_v28 = vadd.f32 1e-05, %v609_v5  ;;  %v358_v8 = vpop.xlane.xlu1 %357  ;;  %v804_v23 = vadd.f32 %v2775_v58, %v768_v60  ;;  %v2999_v62 = vmul.f32 0.0078125, %v354_v3  ;;  %v3001_v26 = vmul.f32 0.0078125, %v352_v25 }
 0x1e2   :  { %v356_v4 = vpop.xlane.xlu0 %355  ;;  %2252 = vrsqrt.f32 %v674_v43  ;;  %v803_v34 = vadd.f32 %v2775_v58, %v767_v2  ;;  %v873_v59 = vpack.c.bf16 %v828_v57, %v827_v37  ;;  %v733_v47 = vmul.f32 %v2247_v48, %v637_v27 }
 0x1e3   :  { %2254 = vrsqrt.f32 %v673_v28  ;;  %v734_v16 = vmul.f32 %v2245_v11, %v638_v41  ;;  %v548_v29 = vmul.f32 %v2999_v62, %v2999_v62  ;;  %v547_v50 = vmul.f32 %v3001_v26, %v3001_v26 }
 0x1e4   :  { %v874_v21 = vpack.c.bf16 %v830_v9, %v829_v38  ;;  %2107 = vmatprep.mubr.bf16.mxu1 %v873_v59  ;;  %v875_v55 = vpack.c.bf16 %v832_v36, %v831_v53  ;;  %v876_v17 = vpack.c.bf16 %v834_v30, %v833_v6  ;;  %v836_v63 = vmax.f32 %v804_v23, 0.0 }
 0x1e5   :  { %v450_v44 = vpop.xlane.xlu1 %449  ;;  %v3016_v33 = vmul.f32 0.0078125, %v358_v8  ;;  %v3018_v27 = vmul.f32 0.0078125, %v356_v4  ;;  %v640_v41 = vsub.f32 %v2568_v31, %v2956_v40  ;;  %v835_v10 = vmax.f32 %v803_v34, 0.0  ;;  %v3604_v31 = vld [vmem:[#allocation9_spill] sm:$0xff] }
 0x1e6   :  { %v448_v24 = vpop.xlane.xlu0 %447  ;;  %2108 = vmatmul.mubr.bf16.gmra.mrb[28].mxu1 %v874_v21  ;;  %v516_v0 = vmul.f32 0.0078125, %v450_v44  ;;  %v769_v15 = vmul.f32 %v2768_v39, %v733_v47  ;;  %v770_v13 = vmul.f32 %v2768_v39, %v734_v16  ;;  %v639_v18 = vsub.f32 %v3603_v22, %v2958_v1 }
 0x1e7   :  { %v515_v51 = vmul.f32 0.0078125, %v448_v24  ;;  %2111 = vmatprep.mubr.bf16.mxu1 %v875_v55  ;;  %v550_v20 = vmul.f32 %v3016_v33, %v3016_v33  ;;  %v549_v6 = vmul.f32 %v3018_v27, %v3018_v27  ;;  %v642_v40 = vsub.f32 %v3604_v31, %v2970_v56  ;;  %v3606_v24 = vld [vmem:[#allocation13_spill] sm:$0xff] }
 0x1e8   :  { %v2249_v45 = vpop.eup %2248  ;;  %v580_v12 = vsub.f32 %v516_v0, %v548_v29  ;;  %v641_v61 = vsub.f32 %v3605_v52, %v2972_v46  ;;  %v805_v32 = vadd.f32 %v2775_v58, %v769_v15  ;;  %v806_v5 = vadd.f32 %v2775_v58, %v770_v13  ;;  %v3607_v0 = vld [vmem:[#allocation11_spill] sm:$0xff] }
 0x1e9   :  { %v579_v35 = vsub.f32 %v515_v51, %v547_v50  ;;  %v2251_v54 = vpop.eup %2250  ;;  %v454_v42 = vpop.xlane.xlu1 %453  ;;  %v736_v25 = vmul.f32 %v2249_v45, %v640_v41  ;;  %v877_v48 = vpack.c.bf16 %v836_v63, %v835_v10  ;;  %v643_v51 = vsub.f32 %v3607_v0, %v3001_v26 }
 0x1ea   :  { %v452_v3 = vpop.xlane.xlu0 %451  ;;  %v612_v7 = vmax.f32 %v580_v12, 0.0  ;;  %v518_v14 = vmul.f32 0.0078125, %v454_v42  ;;  %v735_v2 = vmul.f32 %v2251_v54, %v639_v18  ;;  %v837_v37 = vmax.f32 %v805_v32, 0.0  ;;  %v3609_v54 = vld [vmem:[#allocation10_spill] sm:$0xff] }
 0x1eb   :  { %v611_v19 = vmax.f32 %v579_v35, 0.0  ;;  %v517_v60 = vmul.f32 0.0078125, %v452_v3  ;;  %v772_v1 = vmul.f32 %v2768_v39, %v736_v25  ;;  %v838_v53 = vmax.f32 %v806_v5, 0.0  ;;  %v3063_v5 = vld [vmem:[%s3577_s1 + $0x58] sm:$0x1] }
 0x1ec   :  { %v2253_v11 = vpop.eup %2252  ;;  %v676_v49 = vadd.f32 1e-05, %v612_v7  ;;  %v582_v57 = vsub.f32 %v518_v14, %v550_v20  ;;  %v771_v43 = vmul.f32 %v2768_v39, %v735_v2  ;;  %v3608_v20 = vld [vmem:[#allocation12_spill] sm:$0xff]  ;;  %v645_v22 = vsub.f32 %v3609_v54, %v3018_v27  ;;  %v2199_v54 = vld [vmem:[%s3577_s1 + $0x98] sm:$0xff]  }
 0x1ed   :  { %v675_v56 = vadd.f32 1e-05, %v611_v19  ;;  %v581_v30 = vsub.f32 %v517_v60, %v549_v6  ;;  %v2255_v46 = vpop.eup %2254  ;;  %v808_v28 = vadd.f32 %v2775_v58, %v772_v1  ;;  %v738_v38 = vmul.f32 %v2253_v11, %v642_v40  ;;  %v3610_v1 = vld [vmem:[#allocation6_spill] sm:$0xff] }
 0x1ee   :  { %2256 = vrsqrt.f32 %v676_v49  ;;  %v614_v9 = vmax.f32 %v582_v57, 0.0  ;;  %2112 = vmatmul.mubr.bf16.gmra.mrb[32].mxu1 %v876_v17  ;;  %v737_v4 = vmul.f32 %v2255_v46, %v641_v61  ;;  %v807_v36 = vadd.f32 %v2775_v58, %v771_v43 }
 0x1ef   :  { %v613_v8 = vmax.f32 %v581_v30, 0.0  ;;  %2258 = vrsqrt.f32 %v675_v56  ;;  %2115 = vmatprep.mubr.bf16.mxu1 %v877_v48  ;;  %v774_v47 = vmul.f32 %v2768_v39, %v738_v38  ;;  %v840_v29 = vmax.f32 %v808_v28, 0.0 }
 0x1f0   :  { %v678_v23 = vadd.f32 1e-05, %v614_v9  ;;  %v773_v59 = vmul.f32 %v2768_v39, %v737_v4  ;;  %v839_v16 = vmax.f32 %v807_v36, 0.0  ;;  %v878_v50 = vpack.c.bf16 %v838_v53, %v837_v37 }
 0x1f1   :  { %v677_v34 = vadd.f32 1e-05, %v613_v8  ;;  %v810_v44 = vadd.f32 %v2775_v58, %v774_v47  ;;  %v644_v17 = vsub.f32 %v3606_v24, %v2999_v62  ;;  %v646_v6 = vsub.f32 %v3608_v20, %v3016_v33  ;;  %v2195_v24 = vld [vmem:[%s3577_s1 + $0x78] sm:$0xff]  }
 0x1f2   :  { %2260 = vrsqrt.f32 %v678_v23  ;;  %v809_v21 = vadd.f32 %v2775_v58, %v773_v59  ;;  %v879_v55 = vpack.c.bf16 %v840_v29, %v839_v16  ;;  %v864_v2 = vunpack.c.l.bf16 %v3063_v5  ;;  %v2193_v16 = vld [vmem:[%s3577_s1 + $0x68] sm:$0xff]  }
 0x1f3   :  { %2262 = vrsqrt.f32 %v677_v34  ;;  %v842_v10 = vmax.f32 %v810_v44, 0.0  ;;  %v2192_v34 = vld [vmem:[%s3577_s1 + $0x60] sm:$0xff]  }
 0x1f4   :  { %v841_v41 = vmax.f32 %v809_v21, 0.0  ;;  %2127 = vmatprep.subr.bf16.mxu0 %v2192_v34  ;;  %v2194_v21 = vld [vmem:[%s3577_s1 + $0x70] sm:$0xff]  }
 0x1f5   :  { %2128 = vmatpush3.bf16.msra.mxu0 %v2192_v34 }
 0x1f6   :  { %2116 = vmatmul.mubr.bf16.gmra.mrb[36].mxu1 %v878_v50  ;;  %v880_v62 = vpack.c.bf16 %v842_v10, %v841_v41  ;;  %2129 = vmatprep.subr.bf16.mxu0 %v2193_v16 }
 0x1f7   :  { %2119 = vmatprep.mubr.bf16.mxu1 %v879_v55 }
 0x1f8   :  { %v2257_v63 = vpop.eup %2256 }
 0x1f9   :  { %v2259_v15 = vpop.eup %2258  ;;  %v740_v13 = vmul.f32 %v2257_v63, %v644_v17  ;;  %2130 = vmatpush3.bf16.msra.mxu0 %v2193_v16  ;;  %v2196_v17 = vld [vmem:[%s3577_s1 + $0x80] sm:$0xff]  }
 0x1fa   :  { %v739_v45 = vmul.f32 %v2259_v15, %v643_v51  ;;  %2131 = vmatprep.subr.bf16.mxu0 %v2194_v21 }
 0x1fb   :  { %v776_v12 = vmul.f32 %v2768_v39, %v740_v13  ;;  %v2197_v13 = vld [vmem:[%s3577_s1 + $0x88] sm:$0xff]  }
 0x1fc   :  { %v2261_v35 = vpop.eup %2260  ;;  %v775_v18 = vmul.f32 %v2768_v39, %v739_v45 }
 0x1fd   :  { %v2263_v31 = vpop.eup %2262  ;;  %v812_v26 = vadd.f32 %v2775_v58, %v776_v12  ;;  %v742_v40 = vmul.f32 %v2261_v35, %v646_v6  ;;  %2132 = vmatpush3.bf16.msra.mxu0 %v2194_v21  ;;  %v2198_v6 = vld [vmem:[%s3577_s1 + $0x90] sm:$0xff]  }
 0x1fe   :  { %2120 = vmatmul.mubr.bf16.gmra.mrb[40].mxu1 %v880_v62  ;;  %v811_v52 = vadd.f32 %v2775_v58, %v775_v18  ;;  %v741_v61 = vmul.f32 %v2263_v31, %v645_v22  ;;  %2133 = vmatprep.subr.bf16.mxu0 %v2195_v24 }
 0x1ff   :  { %v844_v42 = vmax.f32 %v812_v26, 0.0  ;;  %v778_v33 = vmul.f32 %v2768_v39, %v742_v40 }
 0x200   :  { %v843_v3 = vmax.f32 %v811_v52, 0.0  ;;  %v777_v25 = vmul.f32 %v2768_v39, %v741_v61  ;;  %v3069_v39 = vrot.slane %v864_v2, %v3610_v1 }
 0x201   :  { %v814_v7 = vadd.f32 %v2775_v58, %v778_v33  ;;  %2134 = vmatpush3.bf16.msra.mxu0 %v2195_v24 }
 0x202   :  { %v881_v27 = vpack.c.bf16 %v844_v42, %v843_v3  ;;  %v813_v19 = vadd.f32 %v2775_v58, %v777_v25  ;;  %2135 = vmatprep.subr.bf16.mxu0 %v2196_v17 }
 0x203   :  { %v846_v14 = vmax.f32 %v814_v7, 0.0 }
 0x204   :  { %2123 = vmatprep.mubr.bf16.mxu1 %v881_v27  ;;  %v845_v60 = vmax.f32 %v813_v19, 0.0 }
 0x205   :  { %2136 = vmatpush3.bf16.msra.mxu0 %v2196_v17 }
 0x206   :  { %v882_v32 = vpack.c.bf16 %v846_v14, %v845_v60  ;;  %2137 = vmatprep.subr.bf16.mxu0 %v2197_v13 }
 0x208   :  { %2124 = vmatmul.mubr.bf16.gmra.mrb[44].mxu1 %v882_v32 }
 0x209   :  { %2138 = vmatpush3.bf16.msra.mxu0 %v2197_v13 }
 0x20a   :  { %2139 = vmatprep.subr.bf16.mxu0 %v2198_v6 }
 0x20d   :  { %2140 = vmatpush3.bf16.msra.mxu0 %v2198_v6 }
 0x20e   :  { %2141 = vmatprep.subr.bf16.mxu0 %v2199_v54 }
 0x211   :  { %2142 = vmatpush3.bf16.msra.mxu0 %v2199_v54 }
 0x278   :  { %v2097_v11 = vpop.f32.mrb[16].mxu1 }
 0x279   :  { %v3072_v58 = vadd.f32 %v2097_v11, %v3069_v39  ;;  %v969_v49 = vpop.f32.mrb[17].mxu1 }
 0x27a   :  { %v2098_v56 = vpop.f32.mrb[18].mxu1  ;;  %v3079_v46 = vadd.f32 %v969_v49, %v3069_v39 }
 0x27b   :  { %v3075_v57 = vadd.f32 %v2098_v56, %v3069_v39  ;;  %1100 = vadd.xlane.f32.xlu0 %v3072_v58  ;;  %v972_v30 = vpop.f32.mrb[19].mxu1  ;;  %v1162_v43 = vmul.f32 %v3072_v58, %v3072_v58 }
 0x27c   :  { %v3083_v48 = vadd.f32 %v972_v30, %v3069_v39  ;;  %v1160_v38 = vmul.f32 %v3079_v46, %v3079_v46 }
 0x27d   :  { %1102 = vadd.xlane.f32.xlu1 %v3075_v57  ;;  %v1163_v28 = vmul.f32 %v3075_v57, %v3075_v57 }
 0x27e   :  { %v1161_v9 = vmul.f32 %v3083_v48, %v3083_v48 }
 0x27f   :  { %1096 = vadd.xlane.f32.xlu0 %v3079_v46 }
 0x281   :  { %1098 = vadd.xlane.f32.xlu1 %v3083_v48 }
 0x283   :  { %1196 = vadd.xlane.f32.xlu0 %v1162_v43 }
 0x285   :  { %1198 = vadd.xlane.f32.xlu1 %v1163_v28 }
 0x287   :  { %1192 = vadd.xlane.f32.xlu0 %v1160_v38 }
 0x289   :  { %1194 = vadd.xlane.f32.xlu1 %v1161_v9 }
 0x295   :  { %v2101_v8 = vpop.f32.mrb[20].mxu1 }
 0x296   :  { %v3096_v4 = vadd.f32 %v2101_v8, %v3069_v39  ;;  %v985_v37 = vpop.f32.mrb[21].mxu1 }
 0x297   :  { %v2102_v53 = vpop.f32.mrb[22].mxu1  ;;  %v3106_v59 = vadd.f32 %v985_v37, %v3069_v39 }
 0x298   :  { %v3099_v36 = vadd.f32 %v2102_v53, %v3069_v39  ;;  %1108 = vadd.xlane.f32.xlu0 %v3096_v4  ;;  %v988_v23 = vpop.f32.mrb[23].mxu1  ;;  %v1166_v29 = vmul.f32 %v3096_v4, %v3096_v4 }
 0x299   :  { %v3110_v47 = vadd.f32 %v988_v23, %v3069_v39  ;;  %v1164_v44 = vmul.f32 %v3106_v59, %v3106_v59 }
 0x29a   :  { %1110 = vadd.xlane.f32.xlu1 %v3099_v36  ;;  %v1167_v50 = vmul.f32 %v3099_v36, %v3099_v36 }
 0x29b   :  { %v1165_v55 = vmul.f32 %v3110_v47, %v3110_v47 }
 0x29c   :  { %1104 = vadd.xlane.f32.xlu0 %v3106_v59 }
 0x29e   :  { %1106 = vadd.xlane.f32.xlu1 %v3110_v47 }
 0x2a0   :  { %1204 = vadd.xlane.f32.xlu0 %v1166_v29 }
 0x2a2   :  { %1206 = vadd.xlane.f32.xlu1 %v1167_v50 }
 0x2a4   :  { %1200 = vadd.xlane.f32.xlu0 %v1164_v44 }
 0x2a6   :  { %1202 = vadd.xlane.f32.xlu1 %v1165_v55 }
 0x2a9   :  { %v2105_v63 = vpop.f32.mrb[24].mxu1 }
 0x2aa   :  { %v3135_v0 = vadd.f32 %v2105_v63, %v3069_v39  ;;  %v1001_v51 = vpop.f32.mrb[25].mxu1 }
 0x2ab   :  { %v2106_v41 = vpop.f32.mrb[26].mxu1  ;;  %v3145_v45 = vadd.f32 %v1001_v51, %v3069_v39 }
 0x2ac   :  { %v3138_v10 = vadd.f32 %v2106_v41, %v3069_v39  ;;  %1116 = vadd.xlane.f32.xlu0 %v3135_v0  ;;  %v1004_v15 = vpop.f32.mrb[27].mxu1  ;;  %v1170_v12 = vmul.f32 %v3135_v0, %v3135_v0 }
 0x2ad   :  { %v3149_v20 = vadd.f32 %v1004_v15, %v3069_v39  ;;  %v1168_v22 = vmul.f32 %v3145_v45, %v3145_v45 }
 0x2ae   :  { %1118 = vadd.xlane.f32.xlu1 %v3138_v10  ;;  %v1171_v35 = vmul.f32 %v3138_v10, %v3138_v10 }
 0x2af   :  { %v1169_v62 = vmul.f32 %v3149_v20, %v3149_v20 }
 0x2b0   :  { %1112 = vadd.xlane.f32.xlu0 %v3145_v45 }
 0x2b2   :  { %1114 = vadd.xlane.f32.xlu1 %v3149_v20 }
 0x2b4   :  { %1212 = vadd.xlane.f32.xlu0 %v1170_v12 }
 0x2b6   :  { %1214 = vadd.xlane.f32.xlu1 %v1171_v35 }
 0x2b8   :  { %1208 = vadd.xlane.f32.xlu0 %v1168_v22 }
 0x2b9   :  { %v2109_v18 = vpop.f32.mrb[28].mxu1 }
 0x2ba   :  { %v3168_v31 = vadd.f32 %v2109_v18, %v3069_v39  ;;  %1210 = vadd.xlane.f32.xlu1 %v1169_v62  ;;  %v1017_v26 = vpop.f32.mrb[29].mxu1 }
 0x2bb   :  { %v2110_v40 = vpop.f32.mrb[30].mxu1  ;;  %v3175_v42 = vadd.f32 %v1017_v26, %v3069_v39 }
 0x2bc   :  { %v3171_v52 = vadd.f32 %v2110_v40, %v3069_v39  ;;  %1124 = vadd.xlane.f32.xlu0 %v3168_v31  ;;  %v1020_v61 = vpop.f32.mrb[31].mxu1  ;;  %v1174_v7 = vmul.f32 %v3168_v31, %v3168_v31 }
 0x2bd   :  { %v3179_v33 = vadd.f32 %v1020_v61, %v3069_v39  ;;  %v1172_v60 = vmul.f32 %v3175_v42, %v3175_v42 }
 0x2be   :  { %1126 = vadd.xlane.f32.xlu1 %v3171_v52  ;;  %v1175_v14 = vmul.f32 %v3171_v52, %v3171_v52 }
 0x2bf   :  { %v1173_v32 = vmul.f32 %v3179_v33, %v3179_v33 }
 0x2c0   :  { %1120 = vadd.xlane.f32.xlu0 %v3175_v42 }
 0x2c1   :  { %v2113_v3 = vpop.f32.mrb[32].mxu1 }
 0x2c2   :  { %v1033_v25 = vpop.f32.mrb[33].mxu1  ;;  %1122 = vadd.xlane.f32.xlu1 %v3179_v33  ;;  %v3192_v49 = vadd.f32 %v2113_v3, %v3069_v39 }
 0x2c3   :  { %v2114_v27 = vpop.f32.mrb[34].mxu1  ;;  %v3199_v38 = vadd.f32 %v1033_v25, %v3069_v39 }
 0x2c4   :  { %v1036_v19 = vpop.f32.mrb[35].mxu1  ;;  %1220 = vadd.xlane.f32.xlu0 %v1174_v7  ;;  %v3195_v43 = vadd.f32 %v2114_v27, %v3069_v39  ;;  %v1178_v53 = vmul.f32 %v3192_v49, %v3192_v49 }
 0x2c5   :  { %v3203_v9 = vadd.f32 %v1036_v19, %v3069_v39  ;;  %v1176_v29 = vmul.f32 %v3199_v38, %v3199_v38 }
 0x2c6   :  { %1222 = vadd.xlane.f32.xlu1 %v1175_v14  ;;  %v1179_v16 = vmul.f32 %v3195_v43, %v3195_v43 }
 0x2c7   :  { %v1177_v50 = vmul.f32 %v3203_v9, %v3203_v9 }
 0x2c8   :  { %1216 = vadd.xlane.f32.xlu0 %v1172_v60 }
 0x2c9   :  { %v2117_v11 = vpop.f32.mrb[36].mxu1 }
 0x2ca   :  { %1218 = vadd.xlane.f32.xlu1 %v1173_v32  ;;  %v1049_v56 = vpop.f32.mrb[37].mxu1  ;;  %v3216_v21 = vadd.f32 %v2117_v11, %v3069_v39 }
 0x2cb   :  { %v2118_v30 = vpop.f32.mrb[38].mxu1  ;;  %v3223_v63 = vadd.f32 %v1049_v56, %v3069_v39 }
 0x2cc   :  { %1132 = vadd.xlane.f32.xlu0 %v3192_v49  ;;  %v1052_v28 = vpop.f32.mrb[39].mxu1  ;;  %v3219_v55 = vadd.f32 %v2118_v30, %v3069_v39  ;;  %v1182_v15 = vmul.f32 %v3216_v21, %v3216_v21 }
 0x2cd   :  { %v3227_v41 = vadd.f32 %v1052_v28, %v3069_v39  ;;  %v1180_v6 = vmul.f32 %v3223_v63, %v3223_v63 }
 0x2ce   :  { %1134 = vadd.xlane.f32.xlu1 %v3195_v43  ;;  %v1183_v13 = vmul.f32 %v3219_v55, %v3219_v55 }
 0x2cf   :  { %v1181_v12 = vmul.f32 %v3227_v41, %v3227_v41 }
 0x2d0   :  { %1128 = vadd.xlane.f32.xlu0 %v3199_v38 }
 0x2d1   :  { %v2121_v8 = vpop.f32.mrb[40].mxu1 }
 0x2d2   :  { %1130 = vadd.xlane.f32.xlu1 %v3203_v9  ;;  %v1065_v37 = vpop.f32.mrb[41].mxu1  ;;  %v3240_v35 = vadd.f32 %v2121_v8, %v3069_v39 }
 0x2d3   :  { %v2122_v23 = vpop.f32.mrb[42].mxu1  ;;  %v3247_v22 = vadd.f32 %v1065_v37, %v3069_v39 }
 0x2d4   :  { %1228 = vadd.xlane.f32.xlu0 %v1178_v53  ;;  %v1068_v34 = vpop.f32.mrb[43].mxu1  ;;  %v3243_v54 = vadd.f32 %v2122_v23, %v3069_v39  ;;  %v1186_v18 = vmul.f32 %v3240_v35, %v3240_v35 }
 0x2d5   :  { %v3251_v62 = vadd.f32 %v1068_v34, %v3069_v39  ;;  %v1184_v40 = vmul.f32 %v3247_v22, %v3247_v22 }
 0x2d6   :  { %1230 = vadd.xlane.f32.xlu1 %v1179_v16  ;;  %v1187_v26 = vmul.f32 %v3243_v54, %v3243_v54 }
 0x2d7   :  { %v1185_v61 = vmul.f32 %v3251_v62, %v3251_v62 }
 0x2d8   :  { %1224 = vadd.xlane.f32.xlu0 %v1176_v29 }
 0x2da   :  { %1226 = vadd.xlane.f32.xlu1 %v1177_v50 }
 0x2db   :  { %v2125_v44 = vpop.f32.mrb[44].mxu1 }
 0x2dc   :  { %1140 = vadd.xlane.f32.xlu0 %v3216_v21  ;;  %v1081_v24 = vpop.f32.mrb[45].mxu1  ;;  %v3264_v3 = vadd.f32 %v2125_v44, %v3069_v39 }
 0x2dd   :  { %v2126_v17 = vpop.f32.mrb[46].mxu1  ;;  %v3271_v7 = vadd.f32 %v1081_v24, %v3069_v39 }
 0x2de   :  { %1142 = vadd.xlane.f32.xlu1 %v3219_v55  ;;  %v1084_v51 = vpop.f32.mrb[47].mxu1  ;;  %v3267_v25 = vadd.f32 %v2126_v17, %v3069_v39  ;;  %v1190_v60 = vmul.f32 %v3264_v3, %v3264_v3 }
 0x2df   :  { %v3275_v27 = vadd.f32 %v1084_v51, %v3069_v39  ;;  %v1188_v19 = vmul.f32 %v3271_v7, %v3271_v7 }
 0x2e0   :  { %1136 = vadd.xlane.f32.xlu0 %v3223_v63  ;;  %v1191_v39 = vmul.f32 %v3267_v25, %v3267_v25 }
 0x2e1   :  { %v1189_v14 = vmul.f32 %v3275_v27, %v3275_v27 }
 0x2e2   :  { %1138 = vadd.xlane.f32.xlu1 %v3227_v41 }
 0x2e4   :  { %1236 = vadd.xlane.f32.xlu0 %v1182_v15 }
 0x2e6   :  { %1238 = vadd.xlane.f32.xlu1 %v1183_v13 }
 0x2e8   :  { %1232 = vadd.xlane.f32.xlu0 %v1180_v6 }
 0x2ea   :  { %1234 = vadd.xlane.f32.xlu1 %v1181_v12 }
 0x2ec   :  { %1148 = vadd.xlane.f32.xlu0 %v3240_v35 }
 0x2ee   :  { %1150 = vadd.xlane.f32.xlu1 %v3243_v54 }
 0x2f0   :  { %1144 = vadd.xlane.f32.xlu0 %v3247_v22 }
 0x2f2   :  { %1146 = vadd.xlane.f32.xlu1 %v3251_v62 }
 0x2f4   :  { %1244 = vadd.xlane.f32.xlu0 %v1186_v18 }
 0x2f6   :  { %1246 = vadd.xlane.f32.xlu1 %v1187_v26 }
 0x2f8   :  { %1240 = vadd.xlane.f32.xlu0 %v1184_v40 }
 0x2fa   :  { %1242 = vadd.xlane.f32.xlu1 %v1185_v61 }
 0x2fc   :  { %1156 = vadd.xlane.f32.xlu0 %v3264_v3 }
 0x2fe   :  { %1158 = vadd.xlane.f32.xlu1 %v3267_v25 }
 0x300   :  { %1152 = vadd.xlane.f32.xlu0 %v3271_v7 }
 0x302   :  { %1154 = vadd.xlane.f32.xlu1 %v3275_v27 }
 0x304   :  { %1248 = vadd.xlane.f32.xlu0 %v1188_v19 }
 0x306   :  { %1250 = vadd.xlane.f32.xlu1 %v1189_v14 }
 0x308   :  { %1252 = vadd.xlane.f32.xlu0 %v1190_v60  ;;  %v1101_v32 = vpop.xlane.xlu0 %1100 }
 0x309   :  { %v1258_v30 = vmul.f32 0.015625, %v1101_v32 }
 0x30a   :  { %1254 = vadd.xlane.f32.xlu1 %v1191_v39  ;;  %v1103_v11 = vpop.xlane.xlu1 %1102 }
 0x30b   :  { %v1259_v8 = vmul.f32 0.015625, %v1103_v11  ;;  %v1322_v53 = vmul.f32 %v1258_v30, %v1258_v30 }
 0x30c   :  { %v1097_v56 = vpop.xlane.xlu0 %1096 }
 0x30d   :  { %v1256_v23 = vmul.f32 0.015625, %v1097_v56  ;;  %v1323_v50 = vmul.f32 %v1259_v8, %v1259_v8 }
 0x30e   :  { %v1099_v28 = vpop.xlane.xlu1 %1098 }
 0x30f   :  { %v1257_v16 = vmul.f32 0.015625, %v1099_v28  ;;  %v1320_v51 = vmul.f32 %v1256_v23, %v1256_v23  ;;  %v865_v28 = vld [vmem:[%s3577_s1 + $0x58] sm:$0x2] }
 0x310   :  { %v1197_v37 = vpop.xlane.xlu0 %1196 }
 0x311   :  { %v1290_v34 = vmul.f32 0.015625, %v1197_v37  ;;  %v1321_v12 = vmul.f32 %v1257_v16, %v1257_v16  ;;  %v1418_v37 = vsub.f32 %v3072_v58, %v1258_v30 }
 0x312   :  { %v1199_v29 = vpop.xlane.xlu1 %1198 }
 0x313   :  { %v1354_v44 = vsub.f32 %v1290_v34, %v1322_v53  ;;  %v1291_v24 = vmul.f32 0.015625, %v1199_v29  ;;  %v866_v34 = vunpack.c.l.bf16 %v865_v28  ;;  %v3611_v29 = vld [vmem:[#allocation5_spill] sm:$0xff] }
 0x314   :  { %v1193_v17 = vpop.xlane.xlu0 %1192  ;;  %v3613_v58 = vsub.s32 2, %v3611_v29 }
 0x315   :  { %v1386_v15 = vmax.f32 %v1354_v44, 0.0  ;;  %v1355_v13 = vsub.f32 %v1291_v24, %v1323_v50  ;;  %v1288_v6 = vmul.f32 0.015625, %v1193_v17  ;;  %v3612_v50 = vsub.s32 1, %v3611_v29 }
 0x316   :  { %v1195_v18 = vpop.xlane.xlu1 %1194  ;;  %v1419_v24 = vsub.f32 %v3075_v57, %v1259_v8  ;;  %v3301_v30 = vrot.slane %v866_v34, %v3613_v58 }
 0x317   :  { %v1450_v26 = vadd.f32 1e-05, %v1386_v15  ;;  %v1387_v40 = vmax.f32 %v1355_v13, 0.0  ;;  %v1352_v61 = vsub.f32 %v1288_v6, %v1320_v51  ;;  %v1289_v19 = vmul.f32 0.015625, %v1195_v18 }
 0x318   :  { %v3295_v44 = vrot.slane %v864_v2, %v3612_v50  ;;  %v1416_v13 = vsub.f32 %v3079_v46, %v1256_v23 }
 0x319   :  { %2264 = vrsqrt.f32 %v1450_v26  ;;  %v1451_v14 = vadd.f32 1e-05, %v1387_v40  ;;  %v1384_v60 = vmax.f32 %v1352_v61, 0.0  ;;  %v1353_v39 = vsub.f32 %v1289_v19, %v1321_v12 }
 0x31a   :  { %v1417_v26 = vsub.f32 %v3083_v48, %v1257_v16 }
 0x31b   :  { %2266 = vrsqrt.f32 %v1451_v14  ;;  %v1448_v32 = vadd.f32 1e-05, %v1384_v60  ;;  %v1385_v11 = vmax.f32 %v1353_v39, 0.0 }
 0x31d   :  { %2268 = vrsqrt.f32 %v1448_v32  ;;  %v1449_v56 = vadd.f32 1e-05, %v1385_v11 }
 0x31f   :  { %2270 = vrsqrt.f32 %v1449_v56 }
 0x323   :  { %v2265_v53 = vpop.eup %2264 }
 0x324   :  { %v1514_v17 = vmul.f32 %v2265_v53, %v1418_v37 }
 0x325   :  { %v1109_v51 = vpop.xlane.xlu0 %1108  ;;  %v2267_v15 = vpop.eup %2266 }
 0x326   :  { %v1515_v6 = vmul.f32 %v2267_v15, %v1419_v24  ;;  %v1550_v2 = vmul.f32 %v3295_v44, %v1514_v17  ;;  %v1262_v61 = vmul.f32 0.015625, %v1109_v51 }
 0x327   :  { %v1111_v12 = vpop.xlane.xlu1 %1110  ;;  %v2269_v18 = vpop.eup %2268 }
 0x328   :  { %v1512_v5 = vmul.f32 %v2269_v18, %v1416_v13  ;;  %v1551_v57 = vmul.f32 %v3295_v44, %v1515_v6  ;;  %v1263_v60 = vmul.f32 0.015625, %v1111_v12  ;;  %v1586_v16 = vadd.f32 %v3301_v30, %v1550_v2 }
 0x329   :  { %v1105_v40 = vpop.xlane.xlu0 %1104  ;;  %v2271_v8 = vpop.eup %2270  ;;  %v1326_v11 = vmul.f32 %v1262_v61, %v1262_v61 }
 0x32a   :  { %v1513_v14 = vmul.f32 %v2271_v8, %v1417_v26  ;;  %v1548_v46 = vmul.f32 %v3295_v44, %v1512_v5  ;;  %v1587_v23 = vadd.f32 %v3301_v30, %v1551_v57  ;;  %v3311_v56 = vmul.f32 0.015625, %v1105_v40 }
 0x32b   :  { %v1107_v19 = vpop.xlane.xlu1 %1106  ;;  %v1327_v50 = vmul.f32 %v1263_v60, %v1263_v60  ;;  %v1618_v6 = vmax.f32 %v1586_v16, 0.0 }
 0x32c   :  { %v1549_v32 = vmul.f32 %v3295_v44, %v1513_v14  ;;  %v1584_v48 = vadd.f32 %v3301_v30, %v1548_v46  ;;  %v3313_v37 = vmul.f32 0.015625, %v1107_v19  ;;  %v1619_v29 = vmax.f32 %v1587_v23, 0.0 }
 0x32d   :  { %v1205_v39 = vpop.xlane.xlu0 %1204  ;;  %v1324_v12 = vmul.f32 %v3311_v56, %v3311_v56 }
 0x32e   :  { %v1294_v28 = vmul.f32 0.015625, %v1205_v39  ;;  %v1585_v34 = vadd.f32 %v3301_v30, %v1549_v32  ;;  %v1616_v15 = vmax.f32 %v1584_v48, 0.0  ;;  %v1325_v40 = vmul.f32 %v3313_v37, %v3313_v37 }
 0x32f   :  { %v1207_v53 = vpop.xlane.xlu1 %1206  ;;  %v1667_v57 = vpack.c.bf16 %v1619_v29, %v1618_v6 }
 0x330   :  { %v1358_v24 = vsub.f32 %v1294_v28, %v1326_v11  ;;  %v1295_v17 = vmul.f32 0.015625, %v1207_v53  ;;  %v1617_v13 = vmax.f32 %v1585_v34, 0.0 }
 0x331   :  { %v1201_v51 = vpop.xlane.xlu0 %1200 }
 0x332   :  { %v1390_v18 = vmax.f32 %v1358_v24, 0.0  ;;  %v1359_v58 = vsub.f32 %v1295_v17, %v1327_v50  ;;  %v1292_v26 = vmul.f32 0.015625, %v1201_v51  ;;  %v1666_v2 = vpack.c.bf16 %v1617_v13, %v1616_v15 }
 0x333   :  { %v1203_v5 = vpop.xlane.xlu1 %1202  ;;  %v1422_v50 = vsub.f32 %v3096_v4, %v1262_v61  ;;  %v1423_v15 = vsub.f32 %v3099_v36, %v1263_v60 }
 0x334   :  { %v1454_v8 = vadd.f32 1e-05, %v1390_v18  ;;  %v1391_v19 = vmax.f32 %v1359_v58, 0.0  ;;  %v1356_v14 = vsub.f32 %v1292_v26, %v1324_v12  ;;  %v1293_v46 = vmul.f32 0.015625, %v1203_v5  ;;  %2143 = vmatprep.mubr.bf16.mxu0 %v1666_v2 }
 0x335   :  { %2144 = vmatmul.mubr.bf16.vlgmr.msra.gmra.mrb[16].mxu0 %v1667_v57 }
 0x336   :  { %2272 = vrsqrt.f32 %v1454_v8  ;;  %v1455_v23 = vadd.f32 1e-05, %v1391_v19  ;;  %v1388_v39 = vmax.f32 %v1356_v14, 0.0  ;;  %v1357_v32 = vsub.f32 %v1293_v46, %v1325_v40 }
 0x337   :  { %v1420_v40 = vsub.f32 %v3106_v59, %v3311_v56  ;;  %v1421_v8 = vsub.f32 %v3110_v47, %v3313_v37 }
 0x338   :  { %2274 = vrsqrt.f32 %v1455_v23  ;;  %v1452_v48 = vadd.f32 1e-05, %v1388_v39  ;;  %v1389_v16 = vmax.f32 %v1357_v32, 0.0 }
 0x339   :  { %v1117_v11 = vpop.xlane.xlu0 %1116 }
 0x33a   :  { %2276 = vrsqrt.f32 %v1452_v48  ;;  %v1453_v28 = vadd.f32 1e-05, %v1389_v16  ;;  %v3320_v29 = vmul.f32 0.015625, %v1117_v11 }
 0x33b   :  { %v1119_v53 = vpop.xlane.xlu1 %1118 }
 0x33c   :  { %2278 = vrsqrt.f32 %v1453_v28  ;;  %v3323_v51 = vmul.f32 0.015625, %v1119_v53  ;;  %v1330_v18 = vmul.f32 %v3320_v29, %v3320_v29 }
 0x33d   :  { %v1113_v34 = vpop.xlane.xlu0 %1112 }
 0x33e   :  { %v3328_v58 = vmul.f32 0.015625, %v1113_v34  ;;  %v1331_v36 = vmul.f32 %v3323_v51, %v3323_v51 }
 0x33f   :  { %v1115_v24 = vpop.xlane.xlu1 %1114 }
 0x340   :  { %v2273_v17 = vpop.eup %2272  ;;  %v3332_v5 = vmul.f32 0.015625, %v1115_v24  ;;  %v1328_v56 = vmul.f32 %v3328_v58, %v3328_v58 }
 0x341   :  { %v1213_v13 = vpop.xlane.xlu0 %1212  ;;  %v1518_v6 = vmul.f32 %v2273_v17, %v1422_v50 }
 0x342   :  { %v2275_v12 = vpop.eup %2274  ;;  %v1298_v26 = vmul.f32 0.015625, %v1213_v13  ;;  %v1329_v16 = vmul.f32 %v3332_v5, %v3332_v5 }
 0x343   :  { %v1215_v4 = vpop.xlane.xlu1 %1214  ;;  %v1519_v61 = vmul.f32 %v2275_v12, %v1423_v15  ;;  %v1554_v46 = vmul.f32 %v3295_v44, %v1518_v6 }
 0x344   :  { %v2277_v2 = vpop.eup %2276  ;;  %v1362_v60 = vsub.f32 %v1298_v26, %v1330_v18  ;;  %v1299_v57 = vmul.f32 0.015625, %v1215_v4 }
 0x345   :  { %v1209_v19 = vpop.xlane.xlu0 %1208  ;;  %v1516_v14 = vmul.f32 %v2277_v2, %v1420_v40  ;;  %v1555_v23 = vmul.f32 %v3295_v44, %v1519_v61  ;;  %v1590_v6 = vadd.f32 %v3301_v30, %v1554_v46 }
 0x346   :  { %v2279_v59 = vpop.eup %2278  ;;  %v1394_v39 = vmax.f32 %v1362_v60, 0.0  ;;  %v1363_v32 = vsub.f32 %v1299_v57, %v1331_v36  ;;  %v1296_v48 = vmul.f32 0.015625, %v1209_v19 }
 0x347   :  { %v1211_v11 = vpop.xlane.xlu1 %1210  ;;  %v1517_v28 = vmul.f32 %v2279_v59, %v1421_v8  ;;  %v1552_v47 = vmul.f32 %v3295_v44, %v1516_v14  ;;  %v1591_v37 = vadd.f32 %v3301_v30, %v1555_v23  ;;  %v1622_v23 = vmax.f32 %v1590_v6, 0.0 }
 0x348   :  { %v1458_v53 = vadd.f32 1e-05, %v1394_v39  ;;  %v1395_v34 = vmax.f32 %v1363_v32, 0.0  ;;  %v1360_v50 = vsub.f32 %v1296_v48, %v1328_v56  ;;  %v1297_v24 = vmul.f32 0.015625, %v1211_v11 }
 0x349   :  { %v1125_v17 = vpop.xlane.xlu0 %1124  ;;  %v1553_v15 = vmul.f32 %v3295_v44, %v1517_v28  ;;  %v1588_v13 = vadd.f32 %v3301_v30, %v1552_v47  ;;  %v1623_v36 = vmax.f32 %v1591_v37, 0.0  ;;  %v1426_v28 = vsub.f32 %v3135_v0, %v3320_v29 }
 0x34a   :  { %2280 = vrsqrt.f32 %v1458_v53  ;;  %v1459_v12 = vadd.f32 1e-05, %v1395_v34  ;;  %v1392_v18 = vmax.f32 %v1360_v50, 0.0  ;;  %v1361_v26 = vsub.f32 %v1297_v24, %v1329_v16 }
 0x34b   :  { %v1127_v40 = vpop.xlane.xlu1 %1126  ;;  %v1589_v4 = vadd.f32 %v3301_v30, %v1553_v15  ;;  %v1620_v57 = vmax.f32 %v1588_v13, 0.0  ;;  %v3350_v14 = vmul.f32 0.015625, %v1125_v17  ;;  %v1669_v39 = vpack.c.bf16 %v1623_v36, %v1622_v23 }
 0x34c   :  { %2282 = vrsqrt.f32 %v1459_v12  ;;  %v1456_v61 = vadd.f32 1e-05, %v1392_v18  ;;  %v1393_v2 = vmax.f32 %v1361_v26, 0.0  ;;  %v3352_v56 = vmul.f32 0.015625, %v1127_v40 }
 0x34d   :  { %v1121_v60 = vpop.xlane.xlu0 %1120  ;;  %v1621_v8 = vmax.f32 %v1589_v4, 0.0  ;;  %v1334_v48 = vmul.f32 %v3350_v14, %v3350_v14  ;;  %v1427_v17 = vsub.f32 %v3138_v10, %v3323_v51  ;;  %v1424_v26 = vsub.f32 %v3145_v45, %v3328_v58 }
 0x34e   :  { %2284 = vrsqrt.f32 %v1456_v61  ;;  %v1457_v19 = vadd.f32 1e-05, %v1393_v2  ;;  %v3356_v16 = vmul.f32 0.015625, %v1121_v60  ;;  %v1335_v34 = vmul.f32 %v3352_v56, %v3352_v56 }
 0x34f   :  { %v1123_v46 = vpop.xlane.xlu1 %1122  ;;  %v1668_v59 = vpack.c.bf16 %v1621_v8, %v1620_v57  ;;  %v1425_v57 = vsub.f32 %v3149_v20, %v3332_v5 }
 0x350   :  { %2286 = vrsqrt.f32 %v1457_v19  ;;  %v3360_v47 = vmul.f32 0.015625, %v1123_v46  ;;  %v1332_v12 = vmul.f32 %v3356_v16, %v3356_v16 }
 0x351   :  { %2147 = vmatprep.mubr.bf16.mxu0 %v1668_v59  ;;  %v1221_v32 = vpop.xlane.xlu0 %1220 }
 0x352   :  { %v1302_v11 = vmul.f32 0.015625, %v1221_v32  ;;  %2148 = vmatmul.mubr.bf16.gmra.mrb[20].mxu0 %v1669_v39  ;;  %v1333_v40 = vmul.f32 %v3360_v47, %v3360_v47 }
 0x353   :  { %v1223_v37 = vpop.xlane.xlu1 %1222 }
 0x354   :  { %v2281_v53 = vpop.eup %2280  ;;  %v1366_v50 = vsub.f32 %v1302_v11, %v1334_v48  ;;  %v1303_v24 = vmul.f32 0.015625, %v1223_v37 }
 0x355   :  { %v1217_v15 = vpop.xlane.xlu0 %1216  ;;  %v1522_v13 = vmul.f32 %v2281_v53, %v1426_v28 }
 0x356   :  { %v2283_v6 = vpop.eup %2282  ;;  %v1398_v18 = vmax.f32 %v1366_v50, 0.0  ;;  %v1367_v0 = vsub.f32 %v1303_v24, %v1335_v34  ;;  %v1300_v29 = vmul.f32 0.015625, %v1217_v15 }
 0x357   :  { %v1219_v4 = vpop.xlane.xlu1 %1218  ;;  %v1523_v61 = vmul.f32 %v2283_v6, %v1427_v17  ;;  %v1558_v23 = vmul.f32 %v3295_v44, %v1522_v13 }
 0x358   :  { %v2285_v2 = vpop.eup %2284  ;;  %v1462_v36 = vadd.f32 1e-05, %v1398_v18  ;;  %v1399_v10 = vmax.f32 %v1367_v0, 0.0  ;;  %v1364_v51 = vsub.f32 %v1300_v29, %v1332_v12  ;;  %v1301_v60 = vmul.f32 0.015625, %v1219_v4 }
 0x359   :  { %v1133_v8 = vpop.xlane.xlu0 %1132  ;;  %v1520_v19 = vmul.f32 %v2285_v2, %v1424_v26  ;;  %v1559_v46 = vmul.f32 %v3295_v44, %v1523_v61  ;;  %v1594_v17 = vadd.f32 %v3301_v30, %v1558_v23  ;;  %v1430_v2 = vsub.f32 %v3168_v31, %v3350_v14 }
 0x35a   :  { %v2287_v45 = vpop.eup %2286  ;;  %2288 = vrsqrt.f32 %v1462_v36  ;;  %v1463_v58 = vadd.f32 1e-05, %v1399_v10  ;;  %v1396_v59 = vmax.f32 %v1364_v51, 0.0  ;;  %v1365_v39 = vsub.f32 %v1301_v60, %v1333_v40 }
 0x35b   :  { %v1135_v32 = vpop.xlane.xlu1 %1134  ;;  %v1521_v48 = vmul.f32 %v2287_v45, %v1425_v57  ;;  %v1556_v11 = vmul.f32 %v3295_v44, %v1520_v19  ;;  %v1595_v20 = vadd.f32 %v3301_v30, %v1559_v46  ;;  %v3380_v24 = vmul.f32 0.015625, %v1133_v8 }
 0x35c   :  { %2290 = vrsqrt.f32 %v1463_v58  ;;  %v1460_v28 = vadd.f32 1e-05, %v1396_v59  ;;  %v1397_v37 = vmax.f32 %v1365_v39, 0.0  ;;  %v3384_v6 = vmul.f32 0.015625, %v1135_v32 }
 0x35d   :  { %v1129_v5 = vpop.xlane.xlu0 %1128  ;;  %v1557_v53 = vmul.f32 %v3295_v44, %v1521_v48  ;;  %v1592_v34 = vadd.f32 %v3301_v30, %v1556_v11  ;;  %v1627_v12 = vmax.f32 %v1595_v20, 0.0  ;;  %v1338_v26 = vmul.f32 %v3380_v24, %v3380_v24 }
 0x35e   :  { %2292 = vrsqrt.f32 %v1460_v28  ;;  %v1461_v50 = vadd.f32 1e-05, %v1397_v37  ;;  %v3388_v40 = vmul.f32 0.015625, %v1129_v5  ;;  %v1626_v61 = vmax.f32 %v1594_v17, 0.0 }
 0x35f   :  { %v1131_v15 = vpop.xlane.xlu1 %1130  ;;  %v1593_v13 = vadd.f32 %v3301_v30, %v1557_v53  ;;  %v1624_v0 = vmax.f32 %v1592_v34, 0.0  ;;  %v1339_v57 = vmul.f32 %v3384_v6, %v3384_v6  ;;  %v1431_v46 = vsub.f32 %v3171_v52, %v3352_v56 }
 0x360   :  { %2294 = vrsqrt.f32 %v1461_v50  ;;  %v3392_v36 = vmul.f32 0.015625, %v1131_v15  ;;  %v1671_v23 = vpack.c.bf16 %v1627_v12, %v1626_v61  ;;  %v1336_v31 = vmul.f32 %v3388_v40, %v3388_v40 }
 0x361   :  { %v1229_v18 = vpop.xlane.xlu0 %1228  ;;  %v1625_v29 = vmax.f32 %v1593_v13, 0.0  ;;  %v1428_v48 = vsub.f32 %v3175_v42, %v3356_v16  ;;  %v1429_v34 = vsub.f32 %v3179_v33, %v3360_v47 }
 0x362   :  { %v1306_v4 = vmul.f32 0.015625, %v1229_v18  ;;  %v1337_v11 = vmul.f32 %v3392_v36, %v3392_v36 }
 0x363   :  { %v1231_v10 = vpop.xlane.xlu1 %1230  ;;  %v1670_v51 = vpack.c.bf16 %v1625_v29, %v1624_v0 }
 0x364   :  { %v2289_v60 = vpop.eup %2288  ;;  %v1370_v8 = vsub.f32 %v1306_v4, %v1338_v26  ;;  %v1307_v19 = vmul.f32 0.015625, %v1231_v10 }
 0x365   :  { %2151 = vmatprep.mubr.bf16.mxu0 %v1670_v51  ;;  %v1225_v45 = vpop.xlane.xlu0 %1224  ;;  %v1526_v58 = vmul.f32 %v2289_v60, %v1430_v2 }
 0x366   :  { %v2291_v59 = vpop.eup %2290  ;;  %v1402_v14 = vmax.f32 %v1370_v8, 0.0  ;;  %v1371_v39 = vsub.f32 %v1307_v19, %v1339_v57  ;;  %v1304_v32 = vmul.f32 0.015625, %v1225_v45  ;;  %2152 = vmatmul.mubr.bf16.gmra.mrb[24].mxu0 %v1671_v23 }
 0x367   :  { %v1227_v28 = vpop.xlane.xlu1 %1226  ;;  %v1527_v37 = vmul.f32 %v2291_v59, %v1431_v46  ;;  %v1562_v15 = vmul.f32 %v3295_v44, %v1526_v58 }
 0x368   :  { %v2293_v52 = vpop.eup %2292  ;;  %v1466_v56 = vadd.f32 1e-05, %v1402_v14  ;;  %v1403_v20 = vmax.f32 %v1371_v39, 0.0  ;;  %v1368_v5 = vsub.f32 %v1304_v32, %v1336_v31  ;;  %v1305_v53 = vmul.f32 0.015625, %v1227_v28 }
 0x369   :  { %v1141_v50 = vpop.xlane.xlu0 %1140  ;;  %v1524_v17 = vmul.f32 %v2293_v52, %v1428_v48  ;;  %v1563_v13 = vmul.f32 %v3295_v44, %v1527_v37  ;;  %v1598_v57 = vadd.f32 %v3301_v30, %v1562_v15  ;;  %v1434_v48 = vsub.f32 %v3192_v49, %v3380_v24 }
 0x36a   :  { %v2295_v42 = vpop.eup %2294  ;;  %2296 = vrsqrt.f32 %v1466_v56  ;;  %v1467_v16 = vadd.f32 1e-05, %v1403_v20  ;;  %v1400_v12 = vmax.f32 %v1368_v5, 0.0  ;;  %v1369_v18 = vsub.f32 %v1305_v53, %v1337_v11 }
 0x36b   :  { %v1143_v0 = vpop.xlane.xlu1 %1142  ;;  %v1525_v29 = vmul.f32 %v2295_v42, %v1429_v34  ;;  %v1560_v26 = vmul.f32 %v3295_v44, %v1524_v17  ;;  %v1599_v33 = vadd.f32 %v3301_v30, %v1563_v13  ;;  %v3412_v60 = vmul.f32 0.015625, %v1141_v50 }
 0x36c   :  { %2298 = vrsqrt.f32 %v1467_v16  ;;  %v1464_v4 = vadd.f32 1e-05, %v1400_v12  ;;  %v1401_v61 = vmax.f32 %v1369_v18, 0.0  ;;  %v3416_v23 = vmul.f32 0.015625, %v1143_v0 }
 0x36d   :  { %v1137_v47 = vpop.xlane.xlu0 %1136  ;;  %v1561_v2 = vmul.f32 %v3295_v44, %v1525_v29  ;;  %v1596_v10 = vadd.f32 %v3301_v30, %v1560_v26  ;;  %v1631_v46 = vmax.f32 %v1599_v33, 0.0  ;;  %v1342_v31 = vmul.f32 %v3412_v60, %v3412_v60 }
 0x36e   :  { %2300 = vrsqrt.f32 %v1464_v4  ;;  %v1465_v51 = vadd.f32 1e-05, %v1401_v61  ;;  %v3420_v14 = vmul.f32 0.015625, %v1137_v47  ;;  %v1630_v32 = vmax.f32 %v1598_v57, 0.0 }
 0x36f   :  { %v1139_v8 = vpop.xlane.xlu1 %1138  ;;  %v1597_v19 = vadd.f32 %v3301_v30, %v1561_v2  ;;  %v1628_v58 = vmax.f32 %v1596_v10, 0.0  ;;  %v1343_v56 = vmul.f32 %v3416_v23, %v3416_v23  ;;  %v1435_v34 = vsub.f32 %v3195_v43, %v3384_v6 }
 0x370   :  { %2302 = vrsqrt.f32 %v1465_v51  ;;  %v3424_v11 = vmul.f32 0.015625, %v1139_v8  ;;  %v1673_v53 = vpack.c.bf16 %v1631_v46, %v1630_v32  ;;  %v1340_v49 = vmul.f32 %v3420_v14, %v3420_v14 }
 0x371   :  { %v1237_v45 = vpop.xlane.xlu0 %1236  ;;  %v1629_v59 = vmax.f32 %v1597_v19, 0.0  ;;  %v1432_v16 = vsub.f32 %v3199_v38, %v3388_v40  ;;  %v1433_v61 = vsub.f32 %v3203_v9, %v3392_v36 }
 0x372   :  { %v1310_v39 = vmul.f32 0.015625, %v1237_v45  ;;  %v1341_v12 = vmul.f32 %v3424_v11, %v3424_v11 }
 0x373   :  { %v1239_v28 = vpop.xlane.xlu1 %1238  ;;  %v1672_v37 = vpack.c.bf16 %v1629_v59, %v1628_v58 }
 0x374   :  { %v2297_v52 = vpop.eup %2296  ;;  %v1374_v20 = vsub.f32 %v1310_v39, %v1342_v31  ;;  %v1311_v5 = vmul.f32 0.015625, %v1239_v28 }
 0x375   :  { %2155 = vmatprep.mubr.bf16.mxu0 %v1672_v37  ;;  %v1233_v50 = vpop.xlane.xlu0 %1232  ;;  %v1530_v17 = vmul.f32 %v2297_v52, %v1434_v48 }
 0x376   :  { %v2299_v15 = vpop.eup %2298  ;;  %v1406_v24 = vmax.f32 %v1374_v20, 0.0  ;;  %v1375_v13 = vsub.f32 %v1311_v5, %v1343_v56  ;;  %v1308_v42 = vmul.f32 0.015625, %v1233_v50  ;;  %2156 = vmatmul.mubr.bf16.gmra.mrb[28].mxu0 %v1673_v53 }
 0x377   :  { %v1235_v18 = vpop.xlane.xlu1 %1234  ;;  %v1531_v0 = vmul.f32 %v2299_v15, %v1435_v34  ;;  %v1566_v2 = vmul.f32 %v3295_v44, %v1530_v17 }
 0x378   :  { %v2301_v43 = vpop.eup %2300  ;;  %v1470_v6 = vadd.f32 1e-05, %v1406_v24  ;;  %v1407_v29 = vmax.f32 %v1375_v13, 0.0  ;;  %v1372_v26 = vsub.f32 %v1308_v42, %v1340_v49  ;;  %v1309_v4 = vmul.f32 0.015625, %v1235_v18 }
 0x379   :  { %v1149_v33 = vpop.xlane.xlu0 %1148  ;;  %v1528_v47 = vmul.f32 %v2301_v43, %v1432_v16  ;;  %v1567_v10 = vmul.f32 %v3295_v44, %v1531_v0  ;;  %v1602_v48 = vadd.f32 %v3301_v30, %v1566_v2  ;;  %v1438_v49 = vsub.f32 %v3216_v21, %v3412_v60 }
 0x37a   :  { %v2303_v38 = vpop.eup %2302  ;;  %2304 = vrsqrt.f32 %v1470_v6  ;;  %v1471_v40 = vadd.f32 1e-05, %v1407_v29  ;;  %v1404_v51 = vmax.f32 %v1372_v26, 0.0  ;;  %v1373_v57 = vsub.f32 %v1309_v4, %v1341_v12 }
 0x37b   :  { %v1151_v8 = vpop.xlane.xlu1 %1150  ;;  %v1529_v19 = vmul.f32 %v2303_v38, %v1433_v61  ;;  %v1564_v46 = vmul.f32 %v3295_v44, %v1528_v47  ;;  %v1603_v9 = vadd.f32 %v3301_v30, %v1567_v10  ;;  %v3444_v32 = vmul.f32 0.015625, %v1149_v33 }
 0x37c   :  { %2306 = vrsqrt.f32 %v1471_v40  ;;  %v1468_v45 = vadd.f32 1e-05, %v1404_v51  ;;  %v1405_v58 = vmax.f32 %v1373_v57, 0.0  ;;  %v3448_v52 = vmul.f32 0.015625, %v1151_v8 }
 0x37d   :  { %v1145_v36 = vpop.xlane.xlu0 %1144  ;;  %v1565_v59 = vmul.f32 %v3295_v44, %v1529_v19  ;;  %v1600_v31 = vadd.f32 %v3301_v30, %v1564_v46  ;;  %v1635_v56 = vmax.f32 %v1603_v9, 0.0  ;;  %v1346_v34 = vmul.f32 %v3444_v32, %v3444_v32 }
 0x37e   :  { %2308 = vrsqrt.f32 %v1468_v45  ;;  %v1469_v39 = vadd.f32 1e-05, %v1405_v58  ;;  %v3452_v50 = vmul.f32 0.015625, %v1145_v36  ;;  %v1634_v15 = vmax.f32 %v1602_v48, 0.0 }
 0x37f   :  { %v1147_v28 = vpop.xlane.xlu1 %1146  ;;  %v1601_v37 = vadd.f32 %v3301_v30, %v1565_v59  ;;  %v1632_v5 = vmax.f32 %v1600_v31, 0.0  ;;  %v1347_v12 = vmul.f32 %v3448_v52, %v3448_v52  ;;  %v1439_v6 = vsub.f32 %v3219_v55, %v3416_v23 }
 0x380   :  { %2310 = vrsqrt.f32 %v1469_v39  ;;  %v3456_v24 = vmul.f32 0.015625, %v1147_v28  ;;  %v1675_v43 = vpack.c.bf16 %v1635_v56, %v1634_v15  ;;  %v1344_v21 = vmul.f32 %v3452_v50, %v3452_v50 }
 0x381   :  { %v1245_v20 = vpop.xlane.xlu0 %1244  ;;  %v1633_v53 = vmax.f32 %v1601_v37, 0.0  ;;  %v1436_v47 = vsub.f32 %v3223_v63, %v3420_v14  ;;  %v1437_v8 = vsub.f32 %v3227_v41, %v3424_v11 }
 0x382   :  { %v1314_v17 = vmul.f32 0.015625, %v1245_v20  ;;  %v1345_v2 = vmul.f32 %v3456_v24, %v3456_v24 }
 0x383   :  { %v1247_v13 = vpop.xlane.xlu1 %1246  ;;  %v1674_v42 = vpack.c.bf16 %v1633_v53, %v1632_v5 }
 0x384   :  { %v2305_v16 = vpop.eup %2304  ;;  %v1378_v18 = vsub.f32 %v1314_v17, %v1346_v34  ;;  %v1315_v0 = vmul.f32 0.015625, %v1247_v13 }
 0x385   :  { %2159 = vmatprep.mubr.bf16.mxu0 %v1674_v42  ;;  %v1241_v29 = vpop.xlane.xlu0 %1240  ;;  %v1534_v26 = vmul.f32 %v2305_v16, %v1438_v49 }
 0x386   :  { %v2307_v4 = vpop.eup %2306  ;;  %v1410_v60 = vmax.f32 %v1378_v18, 0.0  ;;  %v1379_v61 = vsub.f32 %v1315_v0, %v1347_v12  ;;  %v1312_v33 = vmul.f32 0.015625, %v1241_v29  ;;  %2160 = vmatmul.mubr.bf16.gmra.mrb[32].mxu0 %v1675_v43 }
 0x387   :  { %v1243_v10 = vpop.xlane.xlu1 %1242  ;;  %v1535_v38 = vmul.f32 %v2307_v4, %v1439_v6  ;;  %v1570_v45 = vmul.f32 %v3295_v44, %v1534_v26  ;;  %v1442_v6 = vsub.f32 %v3240_v35, %v3444_v32 }
 0x388   :  { %v2309_v55 = vpop.eup %2308  ;;  %v1474_v23 = vadd.f32 1e-05, %v1410_v60  ;;  %v1411_v40 = vmax.f32 %v1379_v61, 0.0  ;;  %v1376_v51 = vsub.f32 %v1312_v33, %v1344_v21  ;;  %v1313_v57 = vmul.f32 0.015625, %v1243_v10 }
 0x389   :  { %v1157_v19 = vpop.xlane.xlu0 %1156  ;;  %v1532_v46 = vmul.f32 %v2309_v55, %v1436_v47  ;;  %v1571_v58 = vmul.f32 %v3295_v44, %v1535_v38  ;;  %v1606_v5 = vadd.f32 %v3301_v30, %v1570_v45 }
 0x38a   :  { %v2311_v63 = vpop.eup %2310  ;;  %2312 = vrsqrt.f32 %v1474_v23  ;;  %v1475_v14 = vadd.f32 1e-05, %v1411_v40  ;;  %v1408_v9 = vmax.f32 %v1376_v51, 0.0  ;;  %v1377_v36 = vsub.f32 %v1313_v57, %v1345_v2 }
 0x38b   :  { %v1159_v59 = vpop.xlane.xlu1 %1158  ;;  %v1533_v31 = vmul.f32 %v2311_v63, %v1437_v8  ;;  %v1568_v39 = vmul.f32 %v3295_v44, %v1532_v46  ;;  %v1607_v41 = vadd.f32 %v3301_v30, %v1571_v58  ;;  %v3482_v12 = vmul.f32 0.015625, %v1157_v19 }
 0x38c   :  { %2314 = vrsqrt.f32 %v1475_v14  ;;  %v1472_v48 = vadd.f32 1e-05, %v1408_v9  ;;  %v1409_v28 = vmax.f32 %v1377_v36, 0.0  ;;  %v1638_v43 = vmax.f32 %v1606_v5, 0.0 }
 0x38d   :  { %v1153_v11 = vpop.xlane.xlu0 %1152  ;;  %v1569_v37 = vmul.f32 %v3295_v44, %v1533_v31  ;;  %v1604_v56 = vadd.f32 %v3301_v30, %v1568_v39  ;;  %v1639_v49 = vmax.f32 %v1607_v41, 0.0  ;;  %v3488_v29 = vmul.f32 0.015625, %v1159_v59 }
 0x38e   :  { %2316 = vrsqrt.f32 %v1472_v48  ;;  %v1473_v20 = vadd.f32 1e-05, %v1409_v28  ;;  %v3477_v53 = vmul.f32 0.015625, %v1153_v11  ;;  %v1443_v2 = vsub.f32 %v3243_v54, %v3448_v52 }
 0x38f   :  { %v1155_v34 = vpop.xlane.xlu1 %1154  ;;  %v1605_v17 = vadd.f32 %v3301_v30, %v1569_v37  ;;  %v1636_v42 = vmax.f32 %v1604_v56, 0.0  ;;  %v1677_v47 = vpack.c.bf16 %v1639_v49, %v1638_v43  ;;  %v1350_v35 = vmul.f32 %v3482_v12, %v3482_v12 }
 0x390   :  { %2318 = vrsqrt.f32 %v1473_v20  ;;  %v3480_v15 = vmul.f32 0.015625, %v1155_v34  ;;  %v1348_v18 = vmul.f32 %v3477_v53, %v3477_v53  ;;  %v1440_v51 = vsub.f32 %v3247_v22, %v3452_v50 }
 0x391   :  { %v1249_v13 = vpop.xlane.xlu0 %1248  ;;  %v1637_v16 = vmax.f32 %v1605_v17, 0.0  ;;  %v1351_v57 = vmul.f32 %v3488_v29, %v3488_v29  ;;  %v1441_v63 = vsub.f32 %v3251_v62, %v3456_v24 }
 0x392   :  { %v1316_v0 = vmul.f32 0.015625, %v1249_v13  ;;  %v1349_v60 = vmul.f32 %v3480_v15, %v3480_v15  ;;  %v1444_v13 = vsub.f32 %v3271_v7, %v3477_v53  ;;  %v1447_v7 = vsub.f32 %v3267_v25, %v3488_v29 }
 0x393   :  { %v1251_v26 = vpop.xlane.xlu1 %1250  ;;  %v1676_v4 = vpack.c.bf16 %v1637_v16, %v1636_v42 }
 0x394   :  { %v2313_v21 = vpop.eup %2312  ;;  %v1380_v61 = vsub.f32 %v1316_v0, %v1348_v18  ;;  %v1317_v33 = vmul.f32 0.015625, %v1251_v26  ;;  %v1445_v0 = vsub.f32 %v3275_v27, %v3480_v15  ;;  %v1446_v26 = vsub.f32 %v3264_v3, %v3482_v12 }
 0x395   :  { %2163 = vmatprep.mubr.bf16.mxu0 %v1676_v4  ;;  %v1253_v10 = vpop.xlane.xlu0 %1252  ;;  %v1538_v38 = vmul.f32 %v2313_v21, %v1442_v6 }
 0x396   :  { %v2315_v55 = vpop.eup %2314  ;;  %v1412_v32 = vmax.f32 %v1380_v61, 0.0  ;;  %v1381_v23 = vsub.f32 %v1317_v33, %v1349_v60  ;;  %v1318_v40 = vmul.f32 0.015625, %v1253_v10  ;;  %2164 = vmatmul.mubr.bf16.gmra.mrb[36].mxu0 %v1677_v47 }
 0x397   :  { %v1255_v8 = vpop.xlane.xlu1 %1254  ;;  %v1539_v19 = vmul.f32 %v2315_v55, %v1443_v2  ;;  %v1574_v9 = vmul.f32 %v3295_v44, %v1538_v38 }
 0x398   :  { %v2317_v54 = vpop.eup %2316  ;;  %v1476_v52 = vadd.f32 1e-05, %v1412_v32  ;;  %v1413_v46 = vmax.f32 %v1381_v23, 0.0  ;;  %v1382_v45 = vsub.f32 %v1318_v40, %v1350_v35  ;;  %v1319_v58 = vmul.f32 0.015625, %v1255_v8  ;;  %v1664_v23 = vld [vmem:[%s3577_s1 + $0xa0] sm:$0x1] }
 0x399   :  { %v1536_v14 = vmul.f32 %v2317_v54, %v1440_v51  ;;  %v1575_v36 = vmul.f32 %v3295_v44, %v1539_v19  ;;  %v1610_v56 = vadd.f32 %v3301_v30, %v1574_v9  ;;  %v1665_v40 = vunpack.c.l.bf16 %v1664_v23  ;;  %s2352_s1 = smov [#allocation2]  }
 0x39a   :  { %v2319_v59 = vpop.eup %2318  ;;  %2320 = vrsqrt.f32 %v1476_v52  ;;  %v1477_v22 = vadd.f32 1e-05, %v1413_v46  ;;  %v1414_v50 = vmax.f32 %v1382_v45, 0.0  ;;  %v1383_v31 = vsub.f32 %v1319_v58, %v1351_v57  ;;  %s1932_s5 = sshll.u32 %s2352_s1, 4  ;;  %s1933_s5 = int_to_ptr.vmem [resolvable:$true] %s1932_s5 }
 0x39b   :  { %v1537_v39 = vmul.f32 %v2319_v59, %v1441_v63  ;;  %v1572_v48 = vmul.f32 %v3295_v44, %v1536_v14  ;;  %v1611_v11 = vadd.f32 %v3301_v30, %v1575_v36  ;;  %v1642_v49 = vmax.f32 %v1610_v56, 0.0  ;;  %s2328_s6 = scalar_lea.vmem %s1933_s5, 4096  ;;  %p2333_p1 = scmp.lt.s32.totalorder %s1933_s5, %s1933_s5 }
 0x39c   :  { %2322 = vrsqrt.f32 %v1477_v22  ;;  %v1478_v28 = vadd.f32 1e-05, %v1414_v50  ;;  %v1415_v41 = vmax.f32 %v1383_v31, 0.0  ;;  %v3530_v51 = vrot.slane %v1665_v40, %v3610_v1  ;;  %p2329_p0 = scmp.ne.s32.totalorder %s1933_s5, %s2328_s6  ;;  %p2334_p2 = scmp.lt.s32.totalorder %s2328_s6, %s2328_s6 }
 0x39d   :  { %v1573_v62 = vmul.f32 %v3295_v44, %v1537_v39  ;;  %v1608_v24 = vadd.f32 %v3301_v30, %v1572_v48  ;;  %v1643_v5 = vmax.f32 %v1611_v11, 0.0 }
 0x39e   :  { %2324 = vrsqrt.f32 %v1478_v28  ;;  %v1479_v37 = vadd.f32 1e-05, %v1415_v41  ;;  %p2335_p3 = por %p2334_p2, %p2333_p1 }
 0x39f   :  { %v1609_v20 = vadd.f32 %v3301_v30, %v1573_v62  ;;  %v1640_v34 = vmax.f32 %v1608_v24, 0.0  ;;  %v1679_v18 = vpack.c.bf16 %v1643_v5, %v1642_v49 }
 0x3a0   :  { %2326 = vrsqrt.f32 %v1479_v37  ;;  %p2336_p4 = pnand %p2335_p3, %p2329_p0 }
 0x3a1   :  { %v1641_v17 = vmax.f32 %v1609_v20, 0.0 }
 0x3a3   :  { %v1678_v42 = vpack.c.bf16 %v1641_v17, %v1640_v34 }
 0x3a4   :  { %v2321_v16 = vpop.eup %2320 }
 0x3a5   :  { %2167 = vmatprep.mubr.bf16.mxu0 %v1678_v42  ;;  %v1540_v43 = vmul.f32 %v2321_v16, %v1444_v13 }
 0x3a6   :  { %v2323_v6 = vpop.eup %2322  ;;  %2168 = vmatmul.mubr.bf16.gmra.mrb[40].mxu0 %v1679_v18 }
 0x3a7   :  { %v1541_v4 = vmul.f32 %v2323_v6, %v1445_v0  ;;  %v1576_v21 = vmul.f32 %v3295_v44, %v1540_v43 }
 0x3a8   :  { %v2325_v60 = vpop.eup %2324 }
 0x3a9   :  { %v1577_v53 = vmul.f32 %v3295_v44, %v1541_v4  ;;  %v1612_v61 = vadd.f32 %v3301_v30, %v1576_v21  ;;  %v1542_v33 = vmul.f32 %v2325_v60, %v1446_v26 }
 0x3aa   :  { %v2327_v27 = vpop.eup %2326 }
 0x3ab   :  { %v1613_v15 = vadd.f32 %v3301_v30, %v1577_v53  ;;  %v1543_v47 = vmul.f32 %v2327_v27, %v1447_v7  ;;  %v1578_v2 = vmul.f32 %v3295_v44, %v1542_v33  ;;  %v1644_v10 = vmax.f32 %v1612_v61, 0.0 }
 0x3ad   :  { %v1645_v3 = vmax.f32 %v1613_v15, 0.0  ;;  %v1579_v12 = vmul.f32 %v3295_v44, %v1543_v47  ;;  %v1614_v38 = vadd.f32 %v3301_v30, %v1578_v2 }
 0x3af   :  { %v1680_v55 = vpack.c.bf16 %v1645_v3, %v1644_v10  ;;  %v1615_v25 = vadd.f32 %v3301_v30, %v1579_v12  ;;  %v1646_v29 = vmax.f32 %v1614_v38, 0.0 }
 0x3b1   :  { %2171 = vmatprep.mubr.bf16.mxu0 %v1680_v55  ;;  %v1647_v35 = vmax.f32 %v1615_v25, 0.0 }
 0x3b3   :  { %v1681_v32 = vpack.c.bf16 %v1647_v35, %v1646_v29 }
 0x3b5   :  { %2172 = vmatmul.mubr.bf16.gmra.mrb[44].mxu0 %v1681_v32 }
 0x408   :  { %v2145_v57 = vpop.f32.mrb[16].mxu0 }
 0x409   :  { %v1777_v44 = vadd.f32 %v2145_v57, %v3530_v51  ;;  %v1768_v8 = vpop.f32.mrb[17].mxu0 }
 0x40a   :  { %v1769_v19 = vadd.f32 %v1768_v8, %v3530_v51  ;;  %v2146_v30 = vpop.f32.mrb[18].mxu0 }
 0x40b   :  { %1897 = vst [vmem:[#allocation2 + $0x10] sm:$0xff] %v1777_v44  ;;  %v1780_v54 = vadd.f32 %v2146_v30, %v3530_v51  ;;  %v1771_v52 = vpop.f32.mrb[19].mxu0 }
 0x40c   :  { %1895 = vst [vmem:[#allocation2] sm:$0xff] %v1769_v19  ;;  %v1772_v46 = vadd.f32 %v1771_v52, %v3530_v51 }
 0x40d   :  { %1898 = vst [vmem:[#allocation2 + $0x18] sm:$0xff] %v1780_v54 }
 0x40e   :  { %1896 = vst [vmem:[#allocation2 + $0x8] sm:$0xff] %v1772_v46 }
 0x425   :  { %v2149_v45 = vpop.f32.mrb[20].mxu0 }
 0x426   :  { %v1793_v1 = vadd.f32 %v2149_v45, %v3530_v51  ;;  %v1784_v58 = vpop.f32.mrb[21].mxu0 }
 0x427   :  { %v1785_v63 = vadd.f32 %v1784_v58, %v3530_v51  ;;  %v2150_v14 = vpop.f32.mrb[22].mxu0 }
 0x428   :  { %1901 = vst [vmem:[#allocation2 + $0x30] sm:$0xff] %v1793_v1  ;;  %v1796_v9 = vadd.f32 %v2150_v14, %v3530_v51  ;;  %v1787_v36 = vpop.f32.mrb[23].mxu0 }
 0x429   :  { %1899 = vst [vmem:[#allocation2 + $0x20] sm:$0xff] %v1785_v63  ;;  %v1788_v59 = vadd.f32 %v1787_v36, %v3530_v51 }
 0x42a   :  { %1902 = vst [vmem:[#allocation2 + $0x38] sm:$0xff] %v1796_v9 }
 0x42b   :  { %1900 = vst [vmem:[#allocation2 + $0x28] sm:$0xff] %v1788_v59 }
 0x439   :  { %v2153_v22 = vpop.f32.mrb[24].mxu0 }
 0x43a   :  { %v1809_v50 = vadd.f32 %v2153_v22, %v3530_v51  ;;  %v1800_v31 = vpop.f32.mrb[25].mxu0 }
 0x43b   :  { %v1801_v39 = vadd.f32 %v1800_v31, %v3530_v51  ;;  %v2154_v48 = vpop.f32.mrb[26].mxu0 }
 0x43c   :  { %1905 = vst [vmem:[#allocation2 + $0x50] sm:$0xff] %v1809_v50  ;;  %v1812_v28 = vadd.f32 %v2154_v48, %v3530_v51  ;;  %v1803_v41 = vpop.f32.mrb[27].mxu0 }
 0x43d   :  { %1903 = vst [vmem:[#allocation2 + $0x40] sm:$0xff] %v1801_v39  ;;  %v1804_v11 = vadd.f32 %v1803_v41, %v3530_v51 }
 0x43e   :  { %1906 = vst [vmem:[#allocation2 + $0x58] sm:$0xff] %v1812_v28 }
 0x43f   :  { %1904 = vst [vmem:[#allocation2 + $0x48] sm:$0xff] %v1804_v11 }
 0x449   :  { %v2157_v62 = vpop.f32.mrb[28].mxu0 }
 0x44a   :  { %v1825_v24 = vadd.f32 %v2157_v62, %v3530_v51  ;;  %v1816_v37 = vpop.f32.mrb[29].mxu0 }
 0x44b   :  { %v1817_v56 = vadd.f32 %v1816_v37, %v3530_v51  ;;  %v2158_v20 = vpop.f32.mrb[30].mxu0 }
 0x44c   :  { %1909 = vst [vmem:[#allocation2 + $0x70] sm:$0xff] %v1825_v24  ;;  %v1828_v5 = vadd.f32 %v2158_v20, %v3530_v51  ;;  %v1819_v34 = vpop.f32.mrb[31].mxu0 }
 0x44d   :  { %1907 = vst [vmem:[#allocation2 + $0x60] sm:$0xff] %v1817_v56  ;;  %v1820_v17 = vadd.f32 %v1819_v34, %v3530_v51 }
 0x44e   :  { %1910 = vst [vmem:[#allocation2 + $0x78] sm:$0xff] %v1828_v5 }
 0x44f   :  { %1908 = vst [vmem:[#allocation2 + $0x68] sm:$0xff] %v1820_v17 }
 0x459   :  { %v2161_v49 = vpop.f32.mrb[32].mxu0 }
 0x45a   :  { %v1841_v13 = vadd.f32 %v2161_v49, %v3530_v51  ;;  %v1832_v42 = vpop.f32.mrb[33].mxu0 }
 0x45b   :  { %v1833_v16 = vadd.f32 %v1832_v42, %v3530_v51  ;;  %v2162_v18 = vpop.f32.mrb[34].mxu0 }
 0x45c   :  { %1913 = vst [vmem:[#allocation2 + $0x90] sm:$0xff] %v1841_v13  ;;  %v1844_v0 = vadd.f32 %v2162_v18, %v3530_v51  ;;  %v1835_v43 = vpop.f32.mrb[35].mxu0 }
 0x45d   :  { %1911 = vst [vmem:[#allocation2 + $0x80] sm:$0xff] %v1833_v16  ;;  %v1836_v6 = vadd.f32 %v1835_v43, %v3530_v51 }
 0x45e   :  { %1914 = vst [vmem:[#allocation2 + $0x98] sm:$0xff] %v1844_v0 }
 0x45f   :  { %1912 = vst [vmem:[#allocation2 + $0x88] sm:$0xff] %v1836_v6 }
 0x469   :  { %v2165_v26 = vpop.f32.mrb[36].mxu0 }
 0x46a   :  { %v1857_v4 = vadd.f32 %v2165_v26, %v3530_v51  ;;  %v1848_v21 = vpop.f32.mrb[37].mxu0 }
 0x46b   :  { %v1849_v60 = vadd.f32 %v1848_v21, %v3530_v51  ;;  %v2166_v7 = vpop.f32.mrb[38].mxu0 }
 0x46c   :  { %1917 = vst [vmem:[#allocation2 + $0xb0] sm:$0xff] %v1857_v4  ;;  %v1860_v53 = vadd.f32 %v2166_v7, %v3530_v51  ;;  %v1851_v61 = vpop.f32.mrb[39].mxu0 }
 0x46d   :  { %1915 = vst [vmem:[#allocation2 + $0xa0] sm:$0xff] %v1849_v60  ;;  %v1852_v33 = vadd.f32 %v1851_v61, %v3530_v51 }
 0x46e   :  { %1918 = vst [vmem:[#allocation2 + $0xb8] sm:$0xff] %v1860_v53 }
 0x46f   :  { %1916 = vst [vmem:[#allocation2 + $0xa8] sm:$0xff] %v1852_v33 }
 0x479   :  { %v2169_v27 = vpop.f32.mrb[40].mxu0 }
 0x47a   :  { %v1873_v15 = vadd.f32 %v2169_v27, %v3530_v51  ;;  %v1864_v47 = vpop.f32.mrb[41].mxu0 }
 0x47b   :  { %v1865_v2 = vadd.f32 %v1864_v47, %v3530_v51  ;;  %v2170_v10 = vpop.f32.mrb[42].mxu0 }
 0x47c   :  { %1921 = vst [vmem:[#allocation2 + $0xd0] sm:$0xff] %v1873_v15  ;;  %v1876_v3 = vadd.f32 %v2170_v10, %v3530_v51  ;;  %v1867_v12 = vpop.f32.mrb[43].mxu0 }
 0x47d   :  { %1919 = vst [vmem:[#allocation2 + $0xc0] sm:$0xff] %v1865_v2  ;;  %v1868_v38 = vadd.f32 %v1867_v12, %v3530_v51 }
 0x47e   :  { %1922 = vst [vmem:[#allocation2 + $0xd8] sm:$0xff] %v1876_v3 }
 0x47f   :  { %1920 = vst [vmem:[#allocation2 + $0xc8] sm:$0xff] %v1868_v38 }
 0x488   :  { %v2173_v55 = vpop.f32.mrb[44].mxu0 }
 0x489   :  { %v1889_v25 = vadd.f32 %v2173_v55, %v3530_v51  ;;  %v1880_v29 = vpop.f32.mrb[45].mxu0 }
 0x48a   :  { %v1881_v35 = vadd.f32 %v1880_v29, %v3530_v51  ;;  %v2174_v32 = vpop.f32.mrb[46].mxu0 }
 0x48b   :  { %1925 = vst [vmem:[#allocation2 + $0xf0] sm:$0xff] %v1889_v25  ;;  %v1892_v23 = vadd.f32 %v2174_v32, %v3530_v51  ;;  %v1883_v40 = vpop.f32.mrb[47].mxu0 }
 0x48c   :  { %1923 = vst [vmem:[#allocation2 + $0xe0] sm:$0xff] %v1881_v35  ;;  %v1884_v57 = vadd.f32 %v1883_v40, %v3530_v51 }
 0x48d   :  { %1926 = vst [vmem:[#allocation2 + $0xf8] sm:$0xff] %v1892_v23 }
 0x48e   :  { %1924 = vst [vmem:[#allocation2 + $0xe8] sm:$0xff] %v1884_v57 }
 0x48f   :  { %2339 = shalt.err (!%p2336_p4)
}
 0x490   :  { %s2340_s9 = scalar_lea.hbm %s3578_s2, 4096 }
 0x491   :  { %p2341_p5 = scmp.ne.s32.totalorder %s3578_s2, %s2340_s9  ;;  %p2344_p6 = scmp.lt.u32.totalorder %s2340_s9, %s3578_s2 }
 0x493   :  { %p2346_p7 = pnand %p2344_p6, %p2341_p5 }
 0x495   :  { %2349 = shalt.err (!%p2346_p7)
}
 0x496   :  { %s2353_s14 = smov 128   ;;  %s2354_s15 = smov 8  }
 0x497   :  { %1938 = dma.vmem_to_hbm [thread:$0]  %s1933_s5, 4096, %s3578_s2, [#allocation3], %s2353_s14, %s2353_s14, %s2354_s15  }
 0x498   :  { %2350 = dma.done.wait [#allocation3], 4096  }
 0x499   :  { %2351 = vsyncadd [#allocation3], 4294963200 }
 0x49a   :  { %1942 = vsyncpa [#allocation3], 1 }

</bundles_post_ra>
